<compile_context>
chip_gen: v5e
topology: v5e:2x2
jax: 0.10.0
libtpu: 0.0.40
codegen_flags: <defaults>
</compile_context>

<pallas_src>
import jax
import jax.numpy as jnp
from jax import lax
from jax.experimental import pallas as pl
from jax.experimental.pallas import tpu as pltpu

# ---------------- model hyper-params (small, consistent with the module) ----
BATCH = 2
SEQ = 8
HIDDEN = 32
FILTER = 64
HEADS = 4                       # head_size
DIVIDE = True
ATT = HIDDEN // HEADS if DIVIDE else HIDDEN   # att_size (d_k = d_v)
QKDIM = HEADS * ATT             # = HIDDEN here
SCALE = ATT ** (-0.5)
EPS = 1e-6
DROPOUT_RATE = 0.1              # eval mode -> dropout is identity

PRECISION = jax.lax.Precision.HIGHEST


def _layernorm(x, gamma, beta):
    mean = jnp.mean(x, axis=-1, keepdims=True)
    var = jnp.mean((x - mean) ** 2, axis=-1, keepdims=True)
    return (x - mean) * jax.lax.rsqrt(var + EPS) * gamma + beta


def encoder_layer_kernel(x_ref, wqkv_ref, wo_ref, w1_ref, w2_ref, vec_ref,
                         out_ref, ctx_ref):
    # Single program: the whole (B*S, H) slab lives in VMEM.
    x = x_ref[...].astype(jnp.float32)                      # (B*S, H)

    # Packed small params: rows of the (8, FILTER) vec tensor.
    ln1_g = vec_ref[0:1, :HIDDEN]
    ln1_b = vec_ref[1:2, :HIDDEN]
    ln2_g = vec_ref[2:3, :HIDDEN]
    ln2_b = vec_ref[3:4, :HIDDEN]
    b1 = vec_ref[4:5, :]                                    # (1, FILTER)
    b2 = vec_ref[5:6, :HIDDEN]                              # (1, H)

    # ---- self_attention_norm (LayerNorm, eps=1e-6) ----
    y = _layernorm(x, ln1_g, ln1_b)

    # ---- MultiHeadAttention(y, y, y): fused QKV projection ----
    # PyTorch Linear is x @ W^T ; weights arrive pre-transposed (in, out).
    qkv = jnp.dot(y, wqkv_ref[...], precision=PRECISION,
                  preferred_element_type=jnp.float32)       # (B*S, 3*QK)

    # ---- per-(batch, head) attention, statically unrolled (2 x 4 = 8) ----
    # All slices are static; sublane offsets (0, 8) are 8-aligned.  The head
    # contexts are scattered into a VMEM scratch so no concatenate / 3-D
    # reshape is ever needed.
    for b in range(BATCH):
        rows = slice(b * SEQ, (b + 1) * SEQ)
        for h in range(HEADS):
            cq = slice(h * ATT, (h + 1) * ATT)
            ck = slice(QKDIM + h * ATT, QKDIM + (h + 1) * ATT)
            cv = slice(2 * QKDIM + h * ATT, 2 * QKDIM + (h + 1) * ATT)
            q = qkv[rows, cq] * SCALE                       # (S, ATT)
            k = qkv[rows, ck]                               # (S, ATT)
            v = qkv[rows, cv]                               # (S, ATT)
            # scores = q @ k^T  (NT matmul on the MXU, no explicit transpose)
            s = lax.dot_general(q, k, (((1,), (1,)), ((), ())),
                                precision=PRECISION,
                                preferred_element_type=jnp.float32)  # (S, S)
            # exact softmax (approx reciprocal removed -- it broke tolerance)
            s = s - jnp.max(s, axis=-1, keepdims=True)
            p = jnp.exp(s)
            p = p / jnp.sum(p, axis=-1, keepdims=True)
            # attention dropout (eval) = identity
            ctx_ref[rows, cq] = jnp.dot(p, v, precision=PRECISION,
                                        preferred_element_type=jnp.float32)

    ctx = ctx_ref[...]                                      # (B*S, QK)
    att = jnp.dot(ctx, wo_ref[...], precision=PRECISION,
                  preferred_element_type=jnp.float32)

    # self_attention_dropout (eval) = identity; residual add
    x1 = x + att

    # ---- ffn_norm + FeedForwardNetwork (dropout = identity) ----
    y2 = _layernorm(x1, ln2_g, ln2_b)
    h1 = jnp.dot(y2, w1_ref[...], precision=PRECISION,
                 preferred_element_type=jnp.float32) + b1
    h1 = jnp.maximum(h1, 0.0)                               # ReLU
    h2 = jnp.dot(h1, w2_ref[...], precision=PRECISION,
                 preferred_element_type=jnp.float32) + b2

    out_ref[...] = (x1 + h2).astype(out_ref.dtype)


def encoder_layer(x, params):
    B, S, H = x.shape
    # Fold batch into the sublane axis (free, XLA-side reshape).
    x2d = x.reshape(B * S, H)

    vmem = pl.BlockSpec(memory_space=pltpu.MemorySpace.VMEM)

    qk = QKDIM
    flops = (2 * B * S * H * 3 * qk                 # fused QKV projection
             + 2 * 2 * B * HEADS * S * S * ATT      # QK^T and P@V
             + 2 * B * S * qk * H                   # output projection
             + 2 * 2 * B * S * H * FILTER)          # FFN (two matmuls)
    transcendentals = B * HEADS * S * S + 2 * B * S
    bytes_accessed = 4 * (2 * B * S * H + H * 3 * qk + qk * H
                          + H * FILTER + FILTER * H + 8 * FILTER)

    out2d = pl.pallas_call(
        encoder_layer_kernel,
        out_shape=jax.ShapeDtypeStruct((B * S, H), x.dtype),
        in_specs=[vmem] * 6,
        out_specs=vmem,
        scratch_shapes=[pltpu.VMEM((B * S, QKDIM), jnp.float32)],
        compiler_params=pltpu.CompilerParams(
            vmem_limit_bytes=32 * 1024 * 1024),
        cost_estimate=pl.CostEstimate(flops=flops,
                                      transcendentals=transcendentals,
                                      bytes_accessed=bytes_accessed),
    )(x2d, params["wqkv_t"], params["wo_t"], params["w1_t"], params["w2_t"],
      params["vec"])
    return out2d.reshape(B, S, H)


def init_params(key):
    """Xavier-uniform Linear weights like the PyTorch __init__ (stored
    pre-transposed as (in, out)).  LayerNorm gamma/beta and FFN biases get
    small random perturbations (instead of exactly 1/0) so the packed-parameter
    path is actually exercised by the correctness check; forward semantics are
    identical for any parameter values."""
    def xavier(k, out_dim, in_dim):
        bound = (6.0 / (in_dim + out_dim)) ** 0.5
        w = jax.random.uniform(k, (out_dim, in_dim), jnp.float32,
                               minval=-bound, maxval=bound)
        return jnp.transpose(w)                       # (in, out)

    keys = jax.random.split(key, 12)
    wq_t = xavier(keys[0], HEADS * ATT, HIDDEN)
    wk_t = xavier(keys[1], HEADS * ATT, HIDDEN)
    wv_t = xavier(keys[2], HEADS * ATT, HIDDEN)
    wo_t = xavier(keys[3], HIDDEN, HEADS * ATT)
    w1_t = xavier(keys[4], FILTER, HIDDEN)
    w2_t = xavier(keys[5], HIDDEN, FILTER)

    ln1_g = 1.0 + 0.1 * jax.random.normal(keys[6], (HIDDEN,), jnp.float32)
    ln1_b = 0.1 * jax.random.normal(keys[7], (HIDDEN,), jnp.float32)
    ln2_g = 1.0 + 0.1 * jax.random.normal(keys[8], (HIDDEN,), jnp.float32)
    ln2_b = 0.1 * jax.random.normal(keys[9], (HIDDEN,), jnp.float32)
    b1 = 0.1 * jax.random.normal(keys[10], (FILTER,), jnp.float32)
    b2 = 0.1 * jax.random.normal(keys[11], (HIDDEN,), jnp.float32)

    # Pack the tiny parameters into one (8, FILTER) tensor (one DMA).
    vec = jnp.zeros((8, FILTER), jnp.float32)
    vec = vec.at[0, :HIDDEN].set(ln1_g)
    vec = vec.at[1, :HIDDEN].set(ln1_b)
    vec = vec.at[2, :HIDDEN].set(ln2_g)
    vec = vec.at[3, :HIDDEN].set(ln2_b)
    vec = vec.at[4, :FILTER].set(b1)
    vec = vec.at[5, :HIDDEN].set(b2)

    return {
        # kernel inputs
        "wqkv_t": jnp.concatenate([wq_t, wk_t, wv_t], axis=1),   # (H, 3*QK)
        "wo_t": wo_t, "w1_t": w1_t, "w2_t": w2_t, "vec": vec,
        # unpacked copies for the pure-JAX reference
        "wq_t": wq_t, "wk_t": wk_t, "wv_t": wv_t,
        "ln1_g": ln1_g, "ln1_b": ln1_b, "ln2_g": ln2_g, "ln2_b": ln2_b,
        "b1": b1, "b2": b2,
    }


def encoder_layer_ref(x, p):
    """Pure-JAX reference reproducing the PyTorch forward (eval mode)."""
    mm = lambda a, b: jnp.matmul(a, b, precision=PRECISION)

    def ln(z, g, b):
        m = jnp.mean(z, axis=-1, keepdims=True)
        v = jnp.mean((z - m) ** 2, axis=-1, keepdims=True)
        return (z - m) / jnp.sqrt(v + EPS) * g + b

    B, S, H = x.shape
    y = ln(x, p["ln1_g"], p["ln1_b"])
    q = mm(y, p["wq_t"]).reshape(B, S, HEADS, ATT) * SCALE
    k = mm(y, p["wk_t"]).reshape(B, S, HEADS, ATT)
    v = mm(y, p["wv_t"]).reshape(B, S, HEADS, ATT)
    q = q.transpose(0, 2, 1, 3)
    k = k.transpose(0, 2, 1, 3)
    v = v.transpose(0, 2, 1, 3)
    s = jnp.einsum("bhqd,bhkd->bhqk", q, k, precision=PRECISION)
    a = jax.nn.softmax(s, axis=-1)
    ctx = jnp.einsum("bhqk,bhkd->bhqd", a, v, precision=PRECISION)
    ctx = ctx.transpose(0, 2, 1, 3).reshape(B, S, HEADS * ATT)
    x = x + mm(ctx, p["wo_t"])
    y = ln(x, p["ln2_g"], p["ln2_b"])
    h1 = jnp.maximum(mm(y, p["w1_t"]) + p["b1"], 0.0)
    h2 = mm(h1, p["w2_t"]) + p["b2"]
    return x + h2


if __name__ == "__main__":
    key = jax.random.PRNGKey(0)
    k_x, k_p = jax.random.split(key)
    x = jax.random.normal(k_x, (BATCH, SEQ, HIDDEN), jnp.float32)
    params = init_params(k_p)

    out = jax.block_until_ready(encoder_layer(x, params))
    ref = encoder_layer_ref(x, params)

    assert out.shape == (BATCH, SEQ, HIDDEN)
    assert jnp.allclose(out, ref, atol=1e-3, rtol=1e-3), "mismatch vs reference"
    print("KERNEL_OK")
</pallas_src>

<mosaic_0001>
module attributes {stable_mosaic.version = 11 : i64} {
  func.func @encoder_layer_kernel(%arg0: memref<16x32xf32, #tpu.memory_space<vmem>>, %arg1: memref<32x96xf32, #tpu.memory_space<vmem>>, %arg2: memref<32x32xf32, #tpu.memory_space<vmem>>, %arg3: memref<32x64xf32, #tpu.memory_space<vmem>>, %arg4: memref<64x32xf32, #tpu.memory_space<vmem>>, %arg5: memref<8x64xf32, #tpu.memory_space<vmem>>, %arg6: memref<16x32xf32, #tpu.memory_space<vmem>>, %arg7: memref<16x32xf32, #tpu.memory_space<vmem>>) attributes {dimension_semantics = [], scalar_prefetch = 0 : i64, scratch_operands = 1 : i64, tpu.core_type = #tpu.core_type<tc>} {
    %c0 = arith.constant 0 : index
    %c0_0 = arith.constant 0 : index
    %0 = vector.load %arg0[%c0, %c0_0] : memref<16x32xf32, #tpu.memory_space<vmem>>, vector<16x32xf32>
    %c0_1 = arith.constant 0 : index
    %c0_2 = arith.constant 0 : index
    %1 = vector.load %arg5[%c0_1, %c0_2] : memref<8x64xf32, #tpu.memory_space<vmem>>, vector<1x32xf32>
    %c1 = arith.constant 1 : index
    %c0_3 = arith.constant 0 : index
    %2 = vector.load %arg5[%c1, %c0_3] : memref<8x64xf32, #tpu.memory_space<vmem>>, vector<1x32xf32>
    %c2 = arith.constant 2 : index
    %c0_4 = arith.constant 0 : index
    %3 = vector.load %arg5[%c2, %c0_4] : memref<8x64xf32, #tpu.memory_space<vmem>>, vector<1x32xf32>
    %c3 = arith.constant 3 : index
    %c0_5 = arith.constant 0 : index
    %4 = vector.load %arg5[%c3, %c0_5] : memref<8x64xf32, #tpu.memory_space<vmem>>, vector<1x32xf32>
    %c4 = arith.constant 4 : index
    %c0_6 = arith.constant 0 : index
    %5 = vector.load %arg5[%c4, %c0_6] : memref<8x64xf32, #tpu.memory_space<vmem>>, vector<1x64xf32>
    %c5 = arith.constant 5 : index
    %c0_7 = arith.constant 0 : index
    %6 = vector.load %arg5[%c5, %c0_7] : memref<8x64xf32, #tpu.memory_space<vmem>>, vector<1x32xf32>
    %cst = arith.constant dense<0.000000e+00> : vector<16xf32>
    %7 = vector.multi_reduction <add>, %0, %cst [1] : vector<16x32xf32> to vector<16xf32>
    %8 = vector.shape_cast %7 : vector<16xf32> to vector<16x1xf32>
    %cst_8 = arith.constant 3.200000e+01 : f32
    %9 = vector.broadcast %cst_8 : f32 to vector<16x1xf32>
    %10 = arith.divf %8, %9 : vector<16x1xf32>
    %11 = vector.broadcast %10 : vector<16x1xf32> to vector<16x32xf32>
    %12 = arith.subf %0, %11 : vector<16x32xf32>
    %13 = arith.mulf %12, %12 : vector<16x32xf32>
    %cst_9 = arith.constant dense<0.000000e+00> : vector<16xf32>
    %14 = vector.multi_reduction <add>, %13, %cst_9 [1] : vector<16x32xf32> to vector<16xf32>
    %15 = vector.shape_cast %14 : vector<16xf32> to vector<16x1xf32>
    %cst_10 = arith.constant 3.200000e+01 : f32
    %16 = vector.broadcast %cst_10 : f32 to vector<16x1xf32>
    %17 = arith.divf %15, %16 : vector<16x1xf32>
    %18 = vector.broadcast %10 : vector<16x1xf32> to vector<16x32xf32>
    %19 = arith.subf %0, %18 : vector<16x32xf32>
    %cst_11 = arith.constant 9.99999997E-7 : f32
    %20 = vector.broadcast %cst_11 : f32 to vector<16x1xf32>
    %21 = arith.addf %17, %20 : vector<16x1xf32>
    %22 = math.rsqrt %21 : vector<16x1xf32>
    %23 = vector.broadcast %22 : vector<16x1xf32> to vector<16x32xf32>
    %24 = arith.mulf %19, %23 : vector<16x32xf32>
    %25 = vector.broadcast %1 : vector<1x32xf32> to vector<16x32xf32>
    %26 = arith.mulf %24, %25 : vector<16x32xf32>
    %27 = vector.broadcast %2 : vector<1x32xf32> to vector<16x32xf32>
    %28 = arith.addf %26, %27 : vector<16x32xf32>
    %c0_12 = arith.constant 0 : index
    %c0_13 = arith.constant 0 : index
    %29 = vector.load %arg1[%c0_12, %c0_13] : memref<32x96xf32, #tpu.memory_space<vmem>>, vector<32x96xf32>
    %cst_14 = arith.constant dense<0.000000e+00> : vector<16x96xf32>
    %30 = tpu.matmul %28, %29, %cst_14 {dimension_numbers = #tpu.dot_dimension_numbers<[1], [0], [0], [1], [0, 0, 1, 1], [], []>, precision = #tpu.contract_precision<fp32>} : vector<16x32xf32>, vector<32x96xf32>, vector<16x96xf32> -> vector<16x96xf32>
    %31 = vector.extract_strided_slice %30 {offsets = [0, 0], sizes = [8, 8], strides = [1, 1]} : vector<16x96xf32> to vector<8x8xf32>
    %cst_15 = arith.constant 0.353553385 : f32
    %32 = vector.broadcast %cst_15 : f32 to vector<8x8xf32>
    %33 = arith.mulf %31, %32 : vector<8x8xf32>
    %34 = vector.extract_strided_slice %30 {offsets = [0, 32], sizes = [8, 8], strides = [1, 1]} : vector<16x96xf32> to vector<8x8xf32>
    %35 = vector.extract_strided_slice %30 {offsets = [0, 64], sizes = [8, 8], strides = [1, 1]} : vector<16x96xf32> to vector<8x8xf32>
    %cst_16 = arith.constant dense<0.000000e+00> : vector<8x8xf32>
    %36 = tpu.matmul %33, %34, %cst_16 {dimension_numbers = #tpu.dot_dimension_numbers<[1], [1], [0], [0], [0, 0, 1, 0], [], []>, precision = #tpu.contract_precision<fp32>} : vector<8x8xf32>, vector<8x8xf32>, vector<8x8xf32> -> vector<8x8xf32>
    %cst_17 = arith.constant dense<0xFF800000> : vector<8xf32>
    %37 = vector.multi_reduction <maximumf>, %36, %cst_17 [1] : vector<8x8xf32> to vector<8xf32>
    %38 = vector.shape_cast %37 : vector<8xf32> to vector<8x1xf32>
    %39 = vector.broadcast %38 : vector<8x1xf32> to vector<8x8xf32>
    %40 = arith.subf %36, %39 : vector<8x8xf32>
    %41 = math.exp %40 : vector<8x8xf32>
    %cst_18 = arith.constant dense<0.000000e+00> : vector<8xf32>
    %42 = vector.multi_reduction <add>, %41, %cst_18 [1] : vector<8x8xf32> to vector<8xf32>
    %43 = vector.shape_cast %42 : vector<8xf32> to vector<8x1xf32>
    %44 = vector.broadcast %43 : vector<8x1xf32> to vector<8x8xf32>
    %45 = arith.divf %41, %44 : vector<8x8xf32>
    %cst_19 = arith.constant dense<0.000000e+00> : vector<8x8xf32>
    %46 = tpu.matmul %45, %35, %cst_19 {dimension_numbers = #tpu.dot_dimension_numbers<[1], [0], [0], [1], [0, 0, 1, 1], [], []>, precision = #tpu.contract_precision<fp32>} : vector<8x8xf32>, vector<8x8xf32>, vector<8x8xf32> -> vector<8x8xf32>
    %c0_20 = arith.constant 0 : index
    %c0_21 = arith.constant 0 : index
    %47 = vector.load %arg7[%c0_20, %c0_21] : memref<16x32xf32, #tpu.memory_space<vmem>>, vector<8x8xf32>
    tpu.vector_store %arg7[%c0_20, %c0_21], %46 {strides = array<i32>} : memref<16x32xf32, #tpu.memory_space<vmem>>, vector<8x8xf32>,
    %48 = vector.extract_strided_slice %30 {offsets = [0, 8], sizes = [8, 8], strides = [1, 1]} : vector<16x96xf32> to vector<8x8xf32>
    %cst_22 = arith.constant 0.353553385 : f32
    %49 = vector.broadcast %cst_22 : f32 to vector<8x8xf32>
    %50 = arith.mulf %48, %49 : vector<8x8xf32>
    %51 = vector.extract_strided_slice %30 {offsets = [0, 40], sizes = [8, 8], strides = [1, 1]} : vector<16x96xf32> to vector<8x8xf32>
    %52 = vector.extract_strided_slice %30 {offsets = [0, 72], sizes = [8, 8], strides = [1, 1]} : vector<16x96xf32> to vector<8x8xf32>
    %cst_23 = arith.constant dense<0.000000e+00> : vector<8x8xf32>
    %53 = tpu.matmul %50, %51, %cst_23 {dimension_numbers = #tpu.dot_dimension_numbers<[1], [1], [0], [0], [0, 0, 1, 0], [], []>, precision = #tpu.contract_precision<fp32>} : vector<8x8xf32>, vector<8x8xf32>, vector<8x8xf32> -> vector<8x8xf32>
    %cst_24 = arith.constant dense<0xFF800000> : vector<8xf32>
    %54 = vector.multi_reduction <maximumf>, %53, %cst_24 [1] : vector<8x8xf32> to vector<8xf32>
    %55 = vector.shape_cast %54 : vector<8xf32> to vector<8x1xf32>
    %56 = vector.broadcast %55 : vector<8x1xf32> to vector<8x8xf32>
    %57 = arith.subf %53, %56 : vector<8x8xf32>
    %58 = math.exp %57 : vector<8x8xf32>
    %cst_25 = arith.constant dense<0.000000e+00> : vector<8xf32>
    %59 = vector.multi_reduction <add>, %58, %cst_25 [1] : vector<8x8xf32> to vector<8xf32>
    %60 = vector.shape_cast %59 : vector<8xf32> to vector<8x1xf32>
    %61 = vector.broadcast %60 : vector<8x1xf32> to vector<8x8xf32>
    %62 = arith.divf %58, %61 : vector<8x8xf32>
    %cst_26 = arith.constant dense<0.000000e+00> : vector<8x8xf32>
    %63 = tpu.matmul %62, %52, %cst_26 {dimension_numbers = #tpu.dot_dimension_numbers<[1], [0], [0], [1], [0, 0, 1, 1], [], []>, precision = #tpu.contract_precision<fp32>} : vector<8x8xf32>, vector<8x8xf32>, vector<8x8xf32> -> vector<8x8xf32>
    %c0_27 = arith.constant 0 : index
    %c8 = arith.constant 8 : index
    %64 = vector.load %arg7[%c0_27, %c8] : memref<16x32xf32, #tpu.memory_space<vmem>>, vector<8x8xf32>
    tpu.vector_store %arg7[%c0_27, %c8], %63 {strides = array<i32>} : memref<16x32xf32, #tpu.memory_space<vmem>>, vector<8x8xf32>,
    %65 = vector.extract_strided_slice %30 {offsets = [0, 16], sizes = [8, 8], strides = [1, 1]} : vector<16x96xf32> to vector<8x8xf32>
    %cst_28 = arith.constant 0.353553385 : f32
    %66 = vector.broadcast %cst_28 : f32 to vector<8x8xf32>
    %67 = arith.mulf %65, %66 : vector<8x8xf32>
    %68 = vector.extract_strided_slice %30 {offsets = [0, 48], sizes = [8, 8], strides = [1, 1]} : vector<16x96xf32> to vector<8x8xf32>
    %69 = vector.extract_strided_slice %30 {offsets = [0, 80], sizes = [8, 8], strides = [1, 1]} : vector<16x96xf32> to vector<8x8xf32>
    %cst_29 = arith.constant dense<0.000000e+00> : vector<8x8xf32>
    %70 = tpu.matmul %67, %68, %cst_29 {dimension_numbers = #tpu.dot_dimension_numbers<[1], [1], [0], [0], [0, 0, 1, 0], [], []>, precision = #tpu.contract_precision<fp32>} : vector<8x8xf32>, vector<8x8xf32>, vector<8x8xf32> -> vector<8x8xf32>
    %cst_30 = arith.constant dense<0xFF800000> : vector<8xf32>
    %71 = vector.multi_reduction <maximumf>, %70, %cst_30 [1] : vector<8x8xf32> to vector<8xf32>
    %72 = vector.shape_cast %71 : vector<8xf32> to vector<8x1xf32>
    %73 = vector.broadcast %72 : vector<8x1xf32> to vector<8x8xf32>
    %74 = arith.subf %70, %73 : vector<8x8xf32>
    %75 = math.exp %74 : vector<8x8xf32>
    %cst_31 = arith.constant dense<0.000000e+00> : vector<8xf32>
    %76 = vector.multi_reduction <add>, %75, %cst_31 [1] : vector<8x8xf32> to vector<8xf32>
    %77 = vector.shape_cast %76 : vector<8xf32> to vector<8x1xf32>
    %78 = vector.broadcast %77 : vector<8x1xf32> to vector<8x8xf32>
    %79 = arith.divf %75, %78 : vector<8x8xf32>
    %cst_32 = arith.constant dense<0.000000e+00> : vector<8x8xf32>
    %80 = tpu.matmul %79, %69, %cst_32 {dimension_numbers = #tpu.dot_dimension_numbers<[1], [0], [0], [1], [0, 0, 1, 1], [], []>, precision = #tpu.contract_precision<fp32>} : vector<8x8xf32>, vector<8x8xf32>, vector<8x8xf32> -> vector<8x8xf32>
    %c0_33 = arith.constant 0 : index
    %c16 = arith.constant 16 : index
    %81 = vector.load %arg7[%c0_33, %c16] : memref<16x32xf32, #tpu.memory_space<vmem>>, vector<8x8xf32>
    tpu.vector_store %arg7[%c0_33, %c16], %80 {strides = array<i32>} : memref<16x32xf32, #tpu.memory_space<vmem>>, vector<8x8xf32>,
    %82 = vector.extract_strided_slice %30 {offsets = [0, 24], sizes = [8, 8], strides = [1, 1]} : vector<16x96xf32> to vector<8x8xf32>
    %cst_34 = arith.constant 0.353553385 : f32
    %83 = vector.broadcast %cst_34 : f32 to vector<8x8xf32>
    %84 = arith.mulf %82, %83 : vector<8x8xf32>
    %85 = vector.extract_strided_slice %30 {offsets = [0, 56], sizes = [8, 8], strides = [1, 1]} : vector<16x96xf32> to vector<8x8xf32>
    %86 = vector.extract_strided_slice %30 {offsets = [0, 88], sizes = [8, 8], strides = [1, 1]} : vector<16x96xf32> to vector<8x8xf32>
    %cst_35 = arith.constant dense<0.000000e+00> : vector<8x8xf32>
    %87 = tpu.matmul %84, %85, %cst_35 {dimension_numbers = #tpu.dot_dimension_numbers<[1], [1], [0], [0], [0, 0, 1, 0], [], []>, precision = #tpu.contract_precision<fp32>} : vector<8x8xf32>, vector<8x8xf32>, vector<8x8xf32> -> vector<8x8xf32>
    %cst_36 = arith.constant dense<0xFF800000> : vector<8xf32>
    %88 = vector.multi_reduction <maximumf>, %87, %cst_36 [1] : vector<8x8xf32> to vector<8xf32>
    %89 = vector.shape_cast %88 : vector<8xf32> to vector<8x1xf32>
    %90 = vector.broadcast %89 : vector<8x1xf32> to vector<8x8xf32>
    %91 = arith.subf %87, %90 : vector<8x8xf32>
    %92 = math.exp %91 : vector<8x8xf32>
    %cst_37 = arith.constant dense<0.000000e+00> : vector<8xf32>
    %93 = vector.multi_reduction <add>, %92, %cst_37 [1] : vector<8x8xf32> to vector<8xf32>
    %94 = vector.shape_cast %93 : vector<8xf32> to vector<8x1xf32>
    %95 = vector.broadcast %94 : vector<8x1xf32> to vector<8x8xf32>
    %96 = arith.divf %92, %95 : vector<8x8xf32>
    %cst_38 = arith.constant dense<0.000000e+00> : vector<8x8xf32>
    %97 = tpu.matmul %96, %86, %cst_38 {dimension_numbers = #tpu.dot_dimension_numbers<[1], [0], [0], [1], [0, 0, 1, 1], [], []>, precision = #tpu.contract_precision<fp32>} : vector<8x8xf32>, vector<8x8xf32>, vector<8x8xf32> -> vector<8x8xf32>
    %c0_39 = arith.constant 0 : index
    %c24 = arith.constant 24 : index
    %98 = vector.load %arg7[%c0_39, %c24] : memref<16x32xf32, #tpu.memory_space<vmem>>, vector<8x8xf32>
    tpu.vector_store %arg7[%c0_39, %c24], %97 {strides = array<i32>} : memref<16x32xf32, #tpu.memory_space<vmem>>, vector<8x8xf32>,
    %99 = vector.extract_strided_slice %30 {offsets = [8, 0], sizes = [8, 8], strides = [1, 1]} : vector<16x96xf32> to vector<8x8xf32>
    %cst_40 = arith.constant 0.353553385 : f32
    %100 = vector.broadcast %cst_40 : f32 to vector<8x8xf32>
    %101 = arith.mulf %99, %100 : vector<8x8xf32>
    %102 = vector.extract_strided_slice %30 {offsets = [8, 32], sizes = [8, 8], strides = [1, 1]} : vector<16x96xf32> to vector<8x8xf32>
    %103 = vector.extract_strided_slice %30 {offsets = [8, 64], sizes = [8, 8], strides = [1, 1]} : vector<16x96xf32> to vector<8x8xf32>
    %cst_41 = arith.constant dense<0.000000e+00> : vector<8x8xf32>
    %104 = tpu.matmul %101, %102, %cst_41 {dimension_numbers = #tpu.dot_dimension_numbers<[1], [1], [0], [0], [0, 0, 1, 0], [], []>, precision = #tpu.contract_precision<fp32>} : vector<8x8xf32>, vector<8x8xf32>, vector<8x8xf32> -> vector<8x8xf32>
    %cst_42 = arith.constant dense<0xFF800000> : vector<8xf32>
    %105 = vector.multi_reduction <maximumf>, %104, %cst_42 [1] : vector<8x8xf32> to vector<8xf32>
    %106 = vector.shape_cast %105 : vector<8xf32> to vector<8x1xf32>
    %107 = vector.broadcast %106 : vector<8x1xf32> to vector<8x8xf32>
    %108 = arith.subf %104, %107 : vector<8x8xf32>
    %109 = math.exp %108 : vector<8x8xf32>
    %cst_43 = arith.constant dense<0.000000e+00> : vector<8xf32>
    %110 = vector.multi_reduction <add>, %109, %cst_43 [1] : vector<8x8xf32> to vector<8xf32>
    %111 = vector.shape_cast %110 : vector<8xf32> to vector<8x1xf32>
    %112 = vector.broadcast %111 : vector<8x1xf32> to vector<8x8xf32>
    %113 = arith.divf %109, %112 : vector<8x8xf32>
    %cst_44 = arith.constant dense<0.000000e+00> : vector<8x8xf32>
    %114 = tpu.matmul %113, %103, %cst_44 {dimension_numbers = #tpu.dot_dimension_numbers<[1], [0], [0], [1], [0, 0, 1, 1], [], []>, precision = #tpu.contract_precision<fp32>} : vector<8x8xf32>, vector<8x8xf32>, vector<8x8xf32> -> vector<8x8xf32>
    %c8_45 = arith.constant 8 : index
    %c0_46 = arith.constant 0 : index
    %115 = vector.load %arg7[%c8_45, %c0_46] : memref<16x32xf32, #tpu.memory_space<vmem>>, vector<8x8xf32>
    tpu.vector_store %arg7[%c8_45, %c0_46], %114 {strides = array<i32>} : memref<16x32xf32, #tpu.memory_space<vmem>>, vector<8x8xf32>,
    %116 = vector.extract_strided_slice %30 {offsets = [8, 8], sizes = [8, 8], strides = [1, 1]} : vector<16x96xf32> to vector<8x8xf32>
    %cst_47 = arith.constant 0.353553385 : f32
    %117 = vector.broadcast %cst_47 : f32 to vector<8x8xf32>
    %118 = arith.mulf %116, %117 : vector<8x8xf32>
    %119 = vector.extract_strided_slice %30 {offsets = [8, 40], sizes = [8, 8], strides = [1, 1]} : vector<16x96xf32> to vector<8x8xf32>
    %120 = vector.extract_strided_slice %30 {offsets = [8, 72], sizes = [8, 8], strides = [1, 1]} : vector<16x96xf32> to vector<8x8xf32>
    %cst_48 = arith.constant dense<0.000000e+00> : vector<8x8xf32>
    %121 = tpu.matmul %118, %119, %cst_48 {dimension_numbers = #tpu.dot_dimension_numbers<[1], [1], [0], [0], [0, 0, 1, 0], [], []>, precision = #tpu.contract_precision<fp32>} : vector<8x8xf32>, vector<8x8xf32>, vector<8x8xf32> -> vector<8x8xf32>
    %cst_49 = arith.constant dense<0xFF800000> : vector<8xf32>
    %122 = vector.multi_reduction <maximumf>, %121, %cst_49 [1] : vector<8x8xf32> to vector<8xf32>
    %123 = vector.shape_cast %122 : vector<8xf32> to vector<8x1xf32>
    %124 = vector.broadcast %123 : vector<8x1xf32> to vector<8x8xf32>
    %125 = arith.subf %121, %124 : vector<8x8xf32>
    %126 = math.exp %125 : vector<8x8xf32>
    %cst_50 = arith.constant dense<0.000000e+00> : vector<8xf32>
    %127 = vector.multi_reduction <add>, %126, %cst_50 [1] : vector<8x8xf32> to vector<8xf32>
    %128 = vector.shape_cast %127 : vector<8xf32> to vector<8x1xf32>
    %129 = vector.broadcast %128 : vector<8x1xf32> to vector<8x8xf32>
    %130 = arith.divf %126, %129 : vector<8x8xf32>
    %cst_51 = arith.constant dense<0.000000e+00> : vector<8x8xf32>
    %131 = tpu.matmul %130, %120, %cst_51 {dimension_numbers = #tpu.dot_dimension_numbers<[1], [0], [0], [1], [0, 0, 1, 1], [], []>, precision = #tpu.contract_precision<fp32>} : vector<8x8xf32>, vector<8x8xf32>, vector<8x8xf32> -> vector<8x8xf32>
    %c8_52 = arith.constant 8 : index
    %c8_53 = arith.constant 8 : index
    %132 = vector.load %arg7[%c8_52, %c8_53] : memref<16x32xf32, #tpu.memory_space<vmem>>, vector<8x8xf32>
    tpu.vector_store %arg7[%c8_52, %c8_53], %131 {strides = array<i32>} : memref<16x32xf32, #tpu.memory_space<vmem>>, vector<8x8xf32>,
    %133 = vector.extract_strided_slice %30 {offsets = [8, 16], sizes = [8, 8], strides = [1, 1]} : vector<16x96xf32> to vector<8x8xf32>
    %cst_54 = arith.constant 0.353553385 : f32
    %134 = vector.broadcast %cst_54 : f32 to vector<8x8xf32>
    %135 = arith.mulf %133, %134 : vector<8x8xf32>
    %136 = vector.extract_strided_slice %30 {offsets = [8, 48], sizes = [8, 8], strides = [1, 1]} : vector<16x96xf32> to vector<8x8xf32>
    %137 = vector.extract_strided_slice %30 {offsets = [8, 80], sizes = [8, 8], strides = [1, 1]} : vector<16x96xf32> to vector<8x8xf32>
    %cst_55 = arith.constant dense<0.000000e+00> : vector<8x8xf32>
    %138 = tpu.matmul %135, %136, %cst_55 {dimension_numbers = #tpu.dot_dimension_numbers<[1], [1], [0], [0], [0, 0, 1, 0], [], []>, precision = #tpu.contract_precision<fp32>} : vector<8x8xf32>, vector<8x8xf32>, vector<8x8xf32> -> vector<8x8xf32>
    %cst_56 = arith.constant dense<0xFF800000> : vector<8xf32>
    %139 = vector.multi_reduction <maximumf>, %138, %cst_56 [1] : vector<8x8xf32> to vector<8xf32>
    %140 = vector.shape_cast %139 : vector<8xf32> to vector<8x1xf32>
    %141 = vector.broadcast %140 : vector<8x1xf32> to vector<8x8xf32>
    %142 = arith.subf %138, %141 : vector<8x8xf32>
    %143 = math.exp %142 : vector<8x8xf32>
    %cst_57 = arith.constant dense<0.000000e+00> : vector<8xf32>
    %144 = vector.multi_reduction <add>, %143, %cst_57 [1] : vector<8x8xf32> to vector<8xf32>
    %145 = vector.shape_cast %144 : vector<8xf32> to vector<8x1xf32>
    %146 = vector.broadcast %145 : vector<8x1xf32> to vector<8x8xf32>
    %147 = arith.divf %143, %146 : vector<8x8xf32>
    %cst_58 = arith.constant dense<0.000000e+00> : vector<8x8xf32>
    %148 = tpu.matmul %147, %137, %cst_58 {dimension_numbers = #tpu.dot_dimension_numbers<[1], [0], [0], [1], [0, 0, 1, 1], [], []>, precision = #tpu.contract_precision<fp32>} : vector<8x8xf32>, vector<8x8xf32>, vector<8x8xf32> -> vector<8x8xf32>
    %c8_59 = arith.constant 8 : index
    %c16_60 = arith.constant 16 : index
    %149 = vector.load %arg7[%c8_59, %c16_60] : memref<16x32xf32, #tpu.memory_space<vmem>>, vector<8x8xf32>
    tpu.vector_store %arg7[%c8_59, %c16_60], %148 {strides = array<i32>} : memref<16x32xf32, #tpu.memory_space<vmem>>, vector<8x8xf32>,
    %150 = vector.extract_strided_slice %30 {offsets = [8, 24], sizes = [8, 8], strides = [1, 1]} : vector<16x96xf32> to vector<8x8xf32>
    %cst_61 = arith.constant 0.353553385 : f32
    %151 = vector.broadcast %cst_61 : f32 to vector<8x8xf32>
    %152 = arith.mulf %150, %151 : vector<8x8xf32>
    %153 = vector.extract_strided_slice %30 {offsets = [8, 56], sizes = [8, 8], strides = [1, 1]} : vector<16x96xf32> to vector<8x8xf32>
    %154 = vector.extract_strided_slice %30 {offsets = [8, 88], sizes = [8, 8], strides = [1, 1]} : vector<16x96xf32> to vector<8x8xf32>
    %cst_62 = arith.constant dense<0.000000e+00> : vector<8x8xf32>
    %155 = tpu.matmul %152, %153, %cst_62 {dimension_numbers = #tpu.dot_dimension_numbers<[1], [1], [0], [0], [0, 0, 1, 0], [], []>, precision = #tpu.contract_precision<fp32>} : vector<8x8xf32>, vector<8x8xf32>, vector<8x8xf32> -> vector<8x8xf32>
    %cst_63 = arith.constant dense<0xFF800000> : vector<8xf32>
    %156 = vector.multi_reduction <maximumf>, %155, %cst_63 [1] : vector<8x8xf32> to vector<8xf32>
    %157 = vector.shape_cast %156 : vector<8xf32> to vector<8x1xf32>
    %158 = vector.broadcast %157 : vector<8x1xf32> to vector<8x8xf32>
    %159 = arith.subf %155, %158 : vector<8x8xf32>
    %160 = math.exp %159 : vector<8x8xf32>
    %cst_64 = arith.constant dense<0.000000e+00> : vector<8xf32>
    %161 = vector.multi_reduction <add>, %160, %cst_64 [1] : vector<8x8xf32> to vector<8xf32>
    %162 = vector.shape_cast %161 : vector<8xf32> to vector<8x1xf32>
    %163 = vector.broadcast %162 : vector<8x1xf32> to vector<8x8xf32>
    %164 = arith.divf %160, %163 : vector<8x8xf32>
    %cst_65 = arith.constant dense<0.000000e+00> : vector<8x8xf32>
    %165 = tpu.matmul %164, %154, %cst_65 {dimension_numbers = #tpu.dot_dimension_numbers<[1], [0], [0], [1], [0, 0, 1, 1], [], []>, precision = #tpu.contract_precision<fp32>} : vector<8x8xf32>, vector<8x8xf32>, vector<8x8xf32> -> vector<8x8xf32>
    %c8_66 = arith.constant 8 : index
    %c24_67 = arith.constant 24 : index
    %166 = vector.load %arg7[%c8_66, %c24_67] : memref<16x32xf32, #tpu.memory_space<vmem>>, vector<8x8xf32>
    tpu.vector_store %arg7[%c8_66, %c24_67], %165 {strides = array<i32>} : memref<16x32xf32, #tpu.memory_space<vmem>>, vector<8x8xf32>,
    %c0_68 = arith.constant 0 : index
    %c0_69 = arith.constant 0 : index
    %167 = vector.load %arg7[%c0_68, %c0_69] : memref<16x32xf32, #tpu.memory_space<vmem>>, vector<16x32xf32>
    %c0_70 = arith.constant 0 : index
    %c0_71 = arith.constant 0 : index
    %168 = vector.load %arg2[%c0_70, %c0_71] : memref<32x32xf32, #tpu.memory_space<vmem>>, vector<32x32xf32>
    %cst_72 = arith.constant dense<0.000000e+00> : vector<16x32xf32>
    %169 = tpu.matmul %167, %168, %cst_72 {dimension_numbers = #tpu.dot_dimension_numbers<[1], [0], [0], [1], [0, 0, 1, 1], [], []>, precision = #tpu.contract_precision<fp32>} : vector<16x32xf32>, vector<32x32xf32>, vector<16x32xf32> -> vector<16x32xf32>
    %170 = arith.addf %0, %169 : vector<16x32xf32>
    %cst_73 = arith.constant dense<0.000000e+00> : vector<16xf32>
    %171 = vector.multi_reduction <add>, %170, %cst_73 [1] : vector<16x32xf32> to vector<16xf32>
    %172 = vector.shape_cast %171 : vector<16xf32> to vector<16x1xf32>
    %cst_74 = arith.constant 3.200000e+01 : f32
    %173 = vector.broadcast %cst_74 : f32 to vector<16x1xf32>
    %174 = arith.divf %172, %173 : vector<16x1xf32>
    %175 = vector.broadcast %174 : vector<16x1xf32> to vector<16x32xf32>
    %176 = arith.subf %170, %175 : vector<16x32xf32>
    %177 = arith.mulf %176, %176 : vector<16x32xf32>
    %cst_75 = arith.constant dense<0.000000e+00> : vector<16xf32>
    %178 = vector.multi_reduction <add>, %177, %cst_75 [1] : vector<16x32xf32> to vector<16xf32>
    %179 = vector.shape_cast %178 : vector<16xf32> to vector<16x1xf32>
    %cst_76 = arith.constant 3.200000e+01 : f32
    %180 = vector.broadcast %cst_76 : f32 to vector<16x1xf32>
    %181 = arith.divf %179, %180 : vector<16x1xf32>
    %182 = vector.broadcast %174 : vector<16x1xf32> to vector<16x32xf32>
    %183 = arith.subf %170, %182 : vector<16x32xf32>
    %cst_77 = arith.constant 9.99999997E-7 : f32
    %184 = vector.broadcast %cst_77 : f32 to vector<16x1xf32>
    %185 = arith.addf %181, %184 : vector<16x1xf32>
    %186 = math.rsqrt %185 : vector<16x1xf32>
    %187 = vector.broadcast %186 : vector<16x1xf32> to vector<16x32xf32>
    %188 = arith.mulf %183, %187 : vector<16x32xf32>
    %189 = vector.broadcast %3 : vector<1x32xf32> to vector<16x32xf32>
    %190 = arith.mulf %188, %189 : vector<16x32xf32>
    %191 = vector.broadcast %4 : vector<1x32xf32> to vector<16x32xf32>
    %192 = arith.addf %190, %191 : vector<16x32xf32>
    %c0_78 = arith.constant 0 : index
    %c0_79 = arith.constant 0 : index
    %193 = vector.load %arg3[%c0_78, %c0_79] : memref<32x64xf32, #tpu.memory_space<vmem>>, vector<32x64xf32>
    %cst_80 = arith.constant dense<0.000000e+00> : vector<16x64xf32>
    %194 = tpu.matmul %192, %193, %cst_80 {dimension_numbers = #tpu.dot_dimension_numbers<[1], [0], [0], [1], [0, 0, 1, 1], [], []>, precision = #tpu.contract_precision<fp32>} : vector<16x32xf32>, vector<32x64xf32>, vector<16x64xf32> -> vector<16x64xf32>
    %195 = vector.broadcast %5 : vector<1x64xf32> to vector<16x64xf32>
    %196 = arith.addf %194, %195 : vector<16x64xf32>
    %cst_81 = arith.constant 0.000000e+00 : f32
    %197 = vector.broadcast %cst_81 : f32 to vector<16x64xf32>
    %198 = arith.maximumf %196, %197 : vector<16x64xf32>
    %c0_82 = arith.constant 0 : index
    %c0_83 = arith.constant 0 : index
    %199 = vector.load %arg4[%c0_82, %c0_83] : memref<64x32xf32, #tpu.memory_space<vmem>>, vector<64x32xf32>
    %cst_84 = arith.constant dense<0.000000e+00> : vector<16x32xf32>
    %200 = tpu.matmul %198, %199, %cst_84 {dimension_numbers = #tpu.dot_dimension_numbers<[1], [0], [0], [1], [0, 0, 1, 1], [], []>, precision = #tpu.contract_precision<fp32>} : vector<16x64xf32>, vector<64x32xf32>, vector<16x32xf32> -> vector<16x32xf32>
    %201 = vector.broadcast %6 : vector<1x32xf32> to vector<16x32xf32>
    %202 = arith.addf %200, %201 : vector<16x32xf32>
    %203 = arith.addf %170, %202 : vector<16x32xf32>
    %c0_85 = arith.constant 0 : index
    %c0_86 = arith.constant 0 : index
    %204 = vector.load %arg6[%c0_85, %c0_86] : memref<16x32xf32, #tpu.memory_space<vmem>>, vector<16x32xf32>
    tpu.vector_store %arg6[%c0_85, %c0_86], %203 {strides = array<i32>} : memref<16x32xf32, #tpu.memory_space<vmem>>, vector<16x32xf32>,
    return
  }
}

</mosaic_0001>

<bundles_post_ra>
// kernel: tpu_custom_call.1
= control target key start
LH: loop header
LB: loop body
LE: loop exit
PB: predicated region body
PF: predicated region fallthrough
CT: control target
= control target key end

     0   :  { %11 = vsyncpa [#allocation4], 0  ;;  %s4499_s0 = inlined_call_operand.hbm [shape: f32[16,32], index: 0, kind: input, shape index: {}]   ;;  %s4500_s1 = inlined_call_operand.vmem [shape: f32[32,96], index: 1, kind: input, shape index: {}]   ;;  %s4501_s2 = inlined_call_operand.vmem [shape: f32[32,32], index: 2, kind: input, shape index: {}]   ;;  %s4502_s3 = inlined_call_operand.vmem [shape: f32[32,64], index: 3, kind: input, shape index: {}]   ;;  %s4503_s4 = inlined_call_operand.vmem [shape: f32[64,32], index: 4, kind: input, shape index: {}]   ;;  %s4504_s5 = inlined_call_operand.hbm [shape: f32[8,64], index: 5, kind: input, shape index: {}]   ;;  %s4505_s6 = inlined_call_operand.hbm [shape: f32[16,32], index: 6, kind: output, shape index: {}]  }
   0x1   :  { %12 = vsyncpa [#allocation7], 0 }
   0x2   :  { %13 = vsyncpa [#allocation5], 0  ;;  %s18_s23 = sshll.u32 %s4499_s0, 4  ;;  %s3996_s24 = smov [#allocation3]   ;;  %s19_s23 = int_to_ptr.hbm [resolvable:$true] %s18_s23 }
   0x3   :  { %s20_s25 = sshll.u32 %s3996_s24, 4  ;;  %s40_s28 = sshll.u32 %s4504_s5, 4  ;;  %s21_s25 = int_to_ptr.vmem [resolvable:$true] %s20_s25  ;;  %s41_s28 = int_to_ptr.hbm [resolvable:$true] %s40_s28 }
   0x4   :  { %s3997_s29 = smov 128   ;;  %s3998_s30 = smov 8  }
   0x5   :  { %26 = dma.hbm_to_vmem [thread:$0]  %s19_s23, 256, %s21_s25, [#allocation4], %s3997_s29, %s3997_s29, %s3998_s30  }
   0x6   :  { %s3999_s7 = smov [#allocation6]  }
   0x7   :  { %s42_s8 = sshll.u32 %s3999_s7, 4  ;;  %s43_s8 = int_to_ptr.vmem [resolvable:$true] %s42_s8 }
   0x8   :  { %45 = dma.hbm_to_vmem [thread:$0]  %s41_s28, 128, %s43_s8, [#allocation7]  }
   0x9   :  { %3990 = dma.done.wait [#allocation4], 256  }
   0xa   :  { %3991 = vsyncadd [#allocation4], 4294967040 }
   0xb   :  { %3992 = dma.done.wait [#allocation7], 128  }
   0xc   :  { %3993 = vsyncadd [#allocation7], 4294967168  ;;  %vm62_vm0 = vcmask 261120   ;;  %v55_v0 = vld [vmem:[#allocation3 + $0x8] sm:$0xff]  ;;  %v54_v2 = vld [vmem:[#allocation3] sm:$0xff]  ;;  %v4000_v4 = vmov 32.0  }
   0xd   :  { %v66_v1 = vsel %vm62_vm0, %v55_v0, 0.0  ;;  %v63_v3 = vsel %vm62_vm0, %v54_v2, 0.0  ;;  %3874 = vrcp.f32 %v4000_v4  ;;  %v123_v21 = vld [vmem:[%s4500_s1 + $0x18] sm:$0xff]  ;;  %v122_v23 = vld [vmem:[%s4500_s1 + $0x10] sm:$0xff]  ;;  %v121_v26 = vld [vmem:[%s4500_s1 + $0x8] sm:$0xff]  ;;  %s4002_s15 = smov 96  }
   0xe   :  { %67 = vadd.xlane.f32.xlu0 %v66_v1  ;;  %v142_v22 = vand.u32 4294901760, %v123_v21  ;;  %v144_v25 = vand.u32 4294901760, %v122_v23  ;;  %v146_v29 = vand.u32 4294901760, %v121_v26  ;;  %v120_v30 = vld [vmem:[%s4500_s1] sm:$0xff]  ;;  %s4001_s1 = smov 64   ;;  %s4003_s16 = smov 120  }
   0xf   :  { %v148_v34 = vand.u32 4294901760, %v120_v30  ;;  %v3868_v59 = vld [vmem:[#allocation6] ss:$0 sm:$0xff]  ;;  %v3869_v63 = vld [vmem:[#allocation6 + $0x1] ss:$0 sm:$0xff]  ;;  %vm350_vm8 = vcmask 64512  }
  0x10   :  { %v180_v24 = vsub.f32 %v123_v21, %v142_v22  ;;  %3841 = vmatpush.msra.mxu2 %v142_v22  ;;  %143 = vmatpush.msra.mxu0 %v142_v22  ;;  %v186_v28 = vsub.f32 %v122_v23, %v144_v25  ;;  %v192_v33 = vsub.f32 %v121_v26, %v146_v29  ;;  %s4004_s17 = smov 56   ;;  %s4005_s18 = smov 80  }
  0x11   :  { %v198_v38 = vsub.f32 %v120_v30, %v148_v34  ;;  %s4006_s19 = smov 112   ;;  %s4007_s20 = smov 88  }
  0x12   :  { %v181_v27 = vand.u32 4294901760, %v180_v24  ;;  %3842 = vmatpush.msra.mxu2 %v144_v25  ;;  %145 = vmatpush.msra.mxu0 %v144_v25  ;;  %v187_v32 = vand.u32 4294901760, %v186_v28  ;;  %v193_v37 = vand.u32 4294901760, %v192_v33  ;;  %s4008_s21 = smov 48   ;;  %s4009_s22 = smov 72  }
  0x13   :  { %v3875_v5 = vpop.eup %3874  ;;  %v199_v41 = vand.u32 4294901760, %v198_v38  ;;  %s4010_s23 = smov 104   ;;  %s4011_s24 = smov 40  }
  0x14   :  { %v70_v6 = vmul.f32 32.0, %v3875_v5  ;;  %vm74_vm1 = vweird.f32 %v3875_v5  ;;  %v182_v31 = vsub.f32 %v180_v24, %v181_v27  ;;  %3843 = vmatpush.msra.mxu2 %v146_v29  ;;  %147 = vmatpush.msra.mxu0 %v146_v29  ;;  %v188_v36 = vsub.f32 %v186_v28, %v187_v32  ;;  %s4012_s25 = smov 24   ;;  %s4013_s26 = smov 16  }
  0x15   :  { %v194_v40 = vsub.f32 %v192_v33, %v193_v37  ;;  %v200_v43 = vsub.f32 %v198_v38, %v199_v41 }
  0x16   :  { %64 = vadd.xlane.f32.xlu0 %v63_v3  ;;  %v71_v7 = vsub.f32 1.0, %v70_v6  ;;  %v183_v35 = vand.u32 4294901760, %v182_v31  ;;  %3844 = vmatpush.msra.mxu2 %v148_v34  ;;  %v189_v39 = vand.u32 4294901760, %v188_v36 }
  0x17   :  { %149 = vmatpush.msra.mxu0 %v148_v34  ;;  %v195_v42 = vand.u32 4294901760, %v194_v40  ;;  %v201_v44 = vand.u32 4294901760, %v200_v43 }
  0x18   :  { %v72_v8 = vmul.f32 %v3875_v5, %v71_v7  ;;  %226 = vmatpush.msrb.mxu2 %v180_v24  ;;  %3845 = vmatpush.msra.mxu3 %v183_v35 }
  0x19   :  { %295 = vmatpush.msrb.mxu0 %v181_v27  ;;  %184 = vmatpush.msra.mxu1 %v183_v35 }
  0x1a   :  { %v73_v9 = vadd.f32 %v3875_v5, %v72_v8  ;;  %229 = vmatpush.msrb.mxu2 %v186_v28  ;;  %3846 = vmatpush.msra.mxu3 %v189_v39 }
  0x1b   :  { %299 = vmatpush.msrb.mxu0 %v187_v32  ;;  %190 = vmatpush.msra.mxu1 %v189_v39 }
  0x1c   :  { %v4061_v10 = vsel %vm74_vm1, %v3875_v5, %v73_v9  ;;  %232 = vmatpush.msrb.mxu2 %v192_v33  ;;  %3847 = vmatpush.msra.mxu3 %v195_v42 }
  0x1d   :  { %303 = vmatpush.msrb.mxu0 %v193_v37  ;;  %196 = vmatpush.msra.mxu1 %v195_v42 }
  0x1e   :  { %235 = vmatpush.msrb.mxu2 %v198_v38  ;;  %3848 = vmatpush.msra.mxu3 %v201_v44 }
  0x1f   :  { %307 = vmatpush.msrb.mxu0 %v199_v41  ;;  %202 = vmatpush.msra.mxu1 %v201_v44 }
  0x20   :  { %260 = vmatpush.msrb.mxu3 %v142_v22 }
  0x21   :  { %330 = vmatpush.msrb.mxu1 %v142_v22 }
  0x22   :  { %262 = vmatpush.msrb.mxu3 %v144_v25 }
  0x23   :  { %332 = vmatpush.msrb.mxu1 %v144_v25 }
  0x24   :  { %264 = vmatpush.msrb.mxu3 %v146_v29 }
  0x25   :  { %334 = vmatpush.msrb.mxu1 %v146_v29 }
  0x26   :  { %266 = vmatpush.msrb.mxu3 %v148_v34 }
  0x27   :  { %336 = vmatpush.msrb.mxu1 %v148_v34 }
  0x81   :  { %v68_v11 = vpop.xlane.xlu0 %67 }
  0x82   :  { %v77_v12 = vmul.f32 %v4061_v10, %v68_v11 }
  0x84   :  { %v4064_v13 = vsub.f32 %v55_v0, %v77_v12 }
  0x86   :  { %v81_v14 = vmul.f32 %v4064_v13, %v4064_v13 }
  0x88   :  { %v85_v15 = vsel %vm62_vm0, %v81_v14, 0.0 }
  0x89   :  { %86 = vadd.xlane.f32.xlu1 %v85_v15  ;;  %v65_v16 = vpop.xlane.xlu0 %64 }
  0x8a   :  { %v76_v17 = vmul.f32 %v4061_v10, %v65_v16 }
  0x8c   :  { %v4070_v18 = vsub.f32 %v54_v2, %v76_v17 }
  0x8e   :  { %v80_v19 = vmul.f32 %v4070_v18, %v4070_v18 }
  0x90   :  { %v82_v20 = vsel %vm62_vm0, %v80_v19, 0.0 }
  0x91   :  { %83 = vadd.xlane.f32.xlu1 %v82_v20 }
  0xfc   :  { %v87_v45 = vpop.xlane.xlu1 %86 }
  0xfd   :  { %v89_v46 = vmul.f32 %v87_v45, %v4061_v10 }
  0xff   :  { %v91_v47 = vadd.f32 1e-06, %v89_v46 }
 0x101   :  { %3876 = vrsqrt.f32 %v91_v47  ;;  %vm108_vm3 = vweird.f32 %v91_v47 }
 0x104   :  { %v84_v48 = vpop.xlane.xlu1 %83 }
 0x105   :  { %v88_v49 = vmul.f32 %v84_v48, %v4061_v10 }
 0x107   :  { %v3877_v50 = vpop.eup %3876  ;;  %v90_v51 = vadd.f32 1e-06, %v88_v49 }
 0x108   :  { %v103_v52 = vmul.f32 %v3877_v50, %v91_v47  ;;  %vm109_vm2 = vweird.f32 %v3877_v50 }
 0x109   :  { %3878 = vrsqrt.f32 %v90_v51  ;;  %vm110_vm4 = vmor %vm108_vm3, %vm109_vm2  ;;  %vm98_vm6 = vweird.f32 %v90_v51 }
 0x10a   :  { %v104_v53 = vmul.f32 %v3877_v50, %v103_v52 }
 0x10c   :  { %v105_v54 = vmul.f32 0.5, %v104_v53 }
 0x10e   :  { %v106_v55 = vsub.f32 1.5, %v105_v54 }
 0x10f   :  { %v3879_v56 = vpop.eup %3878 }
 0x110   :  { %v107_v57 = vmul.f32 %v3877_v50, %v106_v55  ;;  %v93_v58 = vmul.f32 %v3879_v56, %v90_v51  ;;  %vm99_vm5 = vweird.f32 %v3879_v56 }
 0x111   :  { %vm100_vm7 = vmor %vm98_vm6, %vm99_vm5 }
 0x112   :  { %v111_v60 = vsel %vm110_vm4, %v3877_v50, %v107_v57  ;;  %v94_v61 = vmul.f32 %v3879_v56, %v93_v58 }
 0x113   :  { %v113_v62 = vmul.f32 %v111_v60, %v4064_v13 }
 0x114   :  { %v95_v0 = vmul.f32 0.5, %v94_v61 }
 0x115   :  { %v116_v1 = vmul.f32 %v3868_v59, %v113_v62 }
 0x116   :  { %v96_v2 = vsub.f32 1.5, %v95_v0 }
 0x117   :  { %v119_v3 = vadd.f32 %v3869_v63, %v116_v1 }
 0x118   :  { %v97_v4 = vmul.f32 %v3879_v56, %v96_v2 }
 0x119   :  { %v128_v5 = vsel %vm62_vm0, %v119_v3, 0 }
 0x11a   :  { %v101_v6 = vsel %vm100_vm7, %v3879_v56, %v97_v4  ;;  %v158_v7 = vand.u32 4294901760, %v128_v5 }
 0x11b   :  { %v112_v8 = vmul.f32 %v101_v6, %v4070_v18 }
 0x11c   :  { %208 = vmatmul.f32.vlgmr.msra.gmra.mxu3 %v158_v7  ;;  %v159_v9 = vsub.f32 %v128_v5, %v158_v7 }
 0x11d   :  { %v115_v11 = vmul.f32 %v3868_v59, %v112_v8 }
 0x11e   :  { %v160_v12 = vand.u32 4294901760, %v159_v9 }
 0x11f   :  { %v118_v13 = vadd.f32 %v3869_v63, %v115_v11 }
 0x120   :  { %v161_v14 = vsub.f32 %v159_v9, %v160_v12 }
 0x121   :  { %v125_v15 = vsel %vm62_vm0, %v118_v13, 0 }
 0x122   :  { %v162_v16 = vand.u32 4294901760, %v161_v14  ;;  %v150_v17 = vand.u32 4294901760, %v125_v15 }
 0x124   :  { %163 = vmatmul.f32.vlgmr.msra.gmra.mxu2 %v162_v16  ;;  %204 = vmatmul.f32.vlgmr.msra.gmra.mxu1 %v150_v17  ;;  %v151_v19 = vsub.f32 %v125_v15, %v150_v17 }
 0x126   :  { %v152_v20 = vand.u32 4294901760, %v151_v19 }
 0x128   :  { %270 = vmatmul.f32.vlgmr.msrb.gmra.mxu3 %v152_v20  ;;  %v153_v21 = vsub.f32 %v151_v19, %v152_v20 }
 0x12a   :  { %v154_v22 = vand.u32 4294901760, %v153_v21 }
 0x12c   :  { %155 = vmatmul.f32.vlgmr.msra.gmra.mxu0 %v154_v22  ;;  %238 = vmatmul.f32.vlgmr.msrb.gmra.mxu2 %v151_v19 }
 0x12d   :  { %338 = vmatmul.f32.vlgmr.msrb.gmra.mxu1 %v150_v17 }
 0x130   :  { %276 = vmatmul.f32.gmra.mxu3 %v160_v12 }
 0x134   :  { %243 = vmatmul.f32.gmra.mxu2 %v159_v9  ;;  %309 = vmatmul.f32.vlgmr.msrb.gmra.mxu0 %v150_v17 }
 0x135   :  { %342 = vmatmul.f32.gmra.mxu1 %v158_v7 }
 0x13c   :  { %313 = vmatmul.f32.gmra.mxu0 %v158_v7 }
 0x19f   :  { %v4095_v23 = vpop.f32.mrf.mxu3 }
 0x1a1   :  { %v205_v25 = vpop.f32.mrf.mxu1 }
 0x1a7   :  { %v4093_v18 = vpop.f32.mrf.mxu2 }
 0x1a9   :  { %v156_v24 = vpop.f32.mrf.mxu0 }
 0x1aa   :  { %v206_v26 = vadd.f32 %v205_v25, %v156_v24  ;;  %v339_v33 = vpop.f32.mrf.mxu1 }
 0x1ab   :  { %v271_v29 = vpop.f32.mrf.mxu3 }
 0x1af   :  { %v239_v27 = vpop.f32.mrf.mxu2 }
 0x1b0   :  { %v240_v28 = vadd.f32 %v239_v27, %v206_v26 }
 0x1b1   :  { %v310_v31 = vpop.f32.mrf.mxu0 }
 0x1b2   :  { %v272_v30 = vadd.f32 %v271_v29, %v240_v28  ;;  %v4117_v61 = vpop.f32.mrf.mxu1 }
 0x1b3   :  { %v4113_v56 = vpop.f32.mrf.mxu3 }
 0x1b4   :  { %v311_v32 = vadd.f32 %v310_v31, %v272_v30 }
 0x1b6   :  { %v4097_v34 = vadd.f32 %v339_v33, %v311_v32 }
 0x1b7   :  { %v4111_v55 = vpop.f32.mrf.mxu2 }
 0x1b8   :  { %526 = vrot.lane.b32.xlu1 %v4097_v34, %s4001_s1  ;;  %348 = vrot.lane.b32.xlu2 %v4097_v34, %s4002_s15  ;;  %v4104_v35 = vmul.f32 0.35355338, %v4097_v34 }
 0x1b9   :  { %v4115_v59 = vpop.f32.mrf.mxu0 }
 0x1ba   :  { %v352_v36 = vsel %vm350_vm8, %v4104_v35, 0 }
 0x1bb   :  { %v373_v37 = vand.u32 4294901760, %v352_v36 }
 0x1bd   :  { %v374_v38 = vsub.f32 %v352_v36, %v373_v37 }
 0x1bf   :  { %v375_v39 = vand.u32 4294901760, %v374_v38 }
 0x1c0   :  { %679 = vrot.lane.b32.xlu1 %v4104_v35, %s4003_s16 }
 0x1c1   :  { %v376_v42 = vsub.f32 %v374_v38, %v375_v39 }
 0x1c3   :  { %v377_v45 = vand.u32 4294901760, %v376_v42 }
 0x212   :  { %v349_v40 = vpop.permute.xlu2 %348 }
 0x213   :  { %v354_v41 = vsel %vm350_vm8, %v349_v40, 0 }
 0x214   :  { %v371_v43 = vand.u32 4294901760, %v354_v41 }
 0x216   :  { %v398_v44 = vsub.f32 %v354_v41, %v371_v43  ;;  %372 = vmatpush.xpose.msra.mxu2 %v371_v43  ;;  %496 = vmatpush.xpose.msra.mxu1 %v371_v43 }
 0x218   :  { %v399_v46 = vand.u32 4294901760, %v398_v44 }
 0x219   :  { %378 = vmatmul.f32.vlgmr.msra.gmra.mxu2 %v377_v45  ;;  %498 = vmatmul.f32.vlgmr.msra.gmra.mxu1 %v373_v37 }
 0x21a   :  { %425 = vmatpush.xpose.msrb.mxu2 %v398_v44  ;;  %v400_v47 = vsub.f32 %v398_v44, %v399_v46  ;;  %474 = vmatpush.xpose.msra.mxu0 %v399_v46 }
 0x21c   :  { %v401_v48 = vand.u32 4294901760, %v400_v47 }
 0x21d   :  { %476 = vmatmul.f32.vlgmr.msra.gmra.mxu0 %v373_v37 }
 0x21e   :  { %402 = vmatpush.xpose.msra.mxu3 %v401_v48 }
 0x221   :  { %404 = vmatmul.f32.vlgmr.msra.gmra.mxu3 %v373_v37  ;;  %428 = vmatmul.f32.vlgmr.msrb.gmra.mxu2 %v374_v38 }
 0x222   :  { %448 = vmatpush.xpose.msrb.mxu3 %v371_v43 }
 0x229   :  { %452 = vmatmul.f32.vlgmr.msrb.gmra.mxu3 %v375_v39 }
 0x22a   :  { %v527_v49 = vpop.permute.xlu1 %526 }
 0x22b   :  { %v547_v50 = vand.u32 4294901760, %v527_v49 }
 0x22d   :  { %v574_v51 = vsub.f32 %v527_v49, %v547_v50  ;;  %548 = vmatpush.msra.mxu2 %v547_v50  ;;  %624 = vmatpush.msrb.mxu1 %v547_v50 }
 0x22f   :  { %v575_v52 = vand.u32 4294901760, %v574_v51  ;;  %601 = vmatpush.msrb.mxu0 %v574_v51 }
 0x231   :  { %v576_v53 = vsub.f32 %v574_v51, %v575_v52  ;;  %650 = vmatpush.msrb.mxu2 %v575_v52 }
 0x232   :  { %v680_v16 = vpop.permute.xlu1 %679 }
 0x233   :  { %v577_v54 = vand.u32 4294901760, %v576_v53  ;;  %v683_v24 = vsel %vm350_vm8, %v680_v16, 0 }
 0x234   :  { %v704_v28 = vand.u32 4294901760, %v683_v24 }
 0x235   :  { %578 = vmatpush.msra.mxu3 %v577_v54 }
 0x236   :  { %v705_v36 = vsub.f32 %v683_v24, %v704_v28 }
 0x237   :  { %672 = vmatpush.msrb.mxu3 %v547_v50 }
 0x238   :  { %v706_v46 = vand.u32 4294901760, %v705_v36 }
 0x23a   :  { %v707_v53 = vsub.f32 %v705_v36, %v706_v46 }
 0x296   :  { %v499_v4 = vpop.f32.mrf.mxu1 }
 0x29a   :  { %v477_v2 = vpop.f32.mrf.mxu0 }
 0x29c   :  { %v379_v57 = vpop.f32.mrf.mxu2 }
 0x2a4   :  { %v405_v58 = vpop.f32.mrf.mxu3  ;;  %v429_v62 = vpop.f32.mrf.mxu2 }
 0x2a5   :  { %v406_v60 = vadd.f32 %v405_v58, %v379_v57 }
 0x2a7   :  { %v430_v63 = vadd.f32 %v429_v62, %v406_v60  ;;  %v708_v62 = vand.u32 4294901760, %v707_v53 }
 0x2ac   :  { %v453_v0 = vpop.f32.mrf.mxu3 }
 0x2ad   :  { %v454_v1 = vadd.f32 %v453_v0, %v430_v63 }
 0x2af   :  { %v478_v3 = vadd.f32 %v477_v2, %v454_v1 }
 0x2b1   :  { %v500_v5 = vadd.f32 %v499_v4, %v478_v3 }
 0x2b3   :  { %v502_v6 = vsel %vm350_vm8, %v500_v5, -inf }
 0x2b4   :  { %503 = vmax.xlane.f32.xlu2 %v502_v6 }
 0x2cc   :  { %857 = vrot.lane.b32.xlu2 %v4097_v34, %s4004_s17 }
 0x2d4   :  { %1017 = vrot.lane.b32.xlu2 %v4097_v34, %s4005_s18 }
 0x2dc   :  { %1015 = vrot.lane.b32.xlu2 %v4104_v35, %s4006_s19 }
 0x327   :  { %v504_v7 = vpop.xlane.xlu2 %503 }
 0x328   :  { %v505_v8 = vsub.f32 %v500_v5, %v504_v7 }
 0x32a   :  { %v506_v9 = vmul.f32 1.442695, %v505_v8 }
 0x32c   :  { %3880 = vpow2.f32 %v506_v9 }
 0x32f   :  { %v858_v17 = vpop.permute.xlu2 %857 }
 0x330   :  { %v878_v26 = vand.u32 4294901760, %v858_v17 }
 0x332   :  { %v3881_v11 = vpop.eup %3880  ;;  %v905_v32 = vsub.f32 %v858_v17, %v878_v26 }
 0x333   :  { %v508_v12 = vsel %vm350_vm8, %v3881_v11, 0.0 }
 0x334   :  { %509 = vadd.xlane.f32.xlu0 %v508_v12  ;;  %v906_v42 = vand.u32 4294901760, %v905_v32 }
 0x336   :  { %v907_v50 = vsub.f32 %v905_v32, %v906_v42 }
 0x337   :  { %v1018_v37 = vpop.permute.xlu2 %1017 }
 0x338   :  { %v1021_v43 = vsel %vm350_vm8, %v1018_v37, 0  ;;  %v908_v60 = vand.u32 4294901760, %v907_v50 }
 0x339   :  { %v4133_v49 = vand.u32 4294901760, %v1021_v43 }
 0x33b   :  { %v4136_v58 = vsub.f32 %v1021_v43, %v4133_v49 }
 0x33d   :  { %v1066_v63 = vand.u32 4294901760, %v4136_v58 }
 0x33f   :  { %v1067_v0 = vsub.f32 %v4136_v58, %v1066_v63 }
 0x341   :  { %v1068_v1 = vand.u32 4294901760, %v1067_v0 }
 0x348   :  { %681 = vrot.lane.b32.xlu0 %v4097_v34, %s4007_s20 }
 0x3a7   :  { %v510_v13 = vpop.xlane.xlu0 %509 }
 0x3a8   :  { %3882 = vrcp.f32 %v510_v13  ;;  %v522_v20 = vand.u32 2147483648, %v510_v13  ;;  %v520_v22 = vand.u32 2147483647, %v510_v13  ;;  %vm516_vm10 = vweird.f32 %v510_v13 }
 0x3aa   :  { %v523_v27 = vor.u32 1.1754944e-38, %v522_v20  ;;  %vm521_vm12 = vcmp.eq.f32.partialorder %v520_v22, 8.507059e+37 }
 0x3ae   :  { %v3883_v14 = vpop.eup %3882 }
 0x3af   :  { %v512_v15 = vmul.f32 %v3883_v14, %v510_v13  ;;  %vm517_vm9 = vweird.f32 %v3883_v14 }
 0x3b0   :  { %vm518_vm11 = vmor %vm516_vm10, %vm517_vm9 }
 0x3b1   :  { %v513_v19 = vsub.f32 1.0, %v512_v15 }
 0x3b3   :  { %v514_v21 = vmul.f32 %v3883_v14, %v513_v19 }
 0x3b5   :  { %v515_v25 = vadd.f32 %v3883_v14, %v514_v21 }
 0x3b7   :  { %v519_v29 = vsel %vm518_vm11, %v3883_v14, %v515_v25 }
 0x3b8   :  { %v524_v30 = vsel %vm521_vm12, %v523_v27, %v519_v29 }
 0x3b9   :  { %v525_v31 = vmul.f32 %v3881_v11, %v524_v30 }
 0x3ba   :  { %v682_v33 = vpop.permute.xlu0 %681 }
 0x3bb   :  { %v685_v38 = vsel %vm350_vm8, %v682_v33, 0  ;;  %v530_v39 = vsel %vm350_vm8, %v525_v31, 0 }
 0x3bc   :  { %v702_v40 = vand.u32 4294901760, %v685_v38  ;;  %v549_v41 = vand.u32 4294901760, %v530_v39 }
 0x3be   :  { %v729_v44 = vsub.f32 %v685_v38, %v702_v40  ;;  %580 = vmatmul.f32.vlgmr.msra.gmra.mxu3 %v549_v41  ;;  %703 = vmatpush.xpose.msra.mxu0 %v702_v40  ;;  %v550_v45 = vsub.f32 %v530_v39, %v549_v41  ;;  %v1016_v38 = vpop.permute.xlu2 %1015 }
 0x3bf   :  { %779 = vmatpush.xpose.msra.mxu3 %v702_v40 }
 0x3c0   :  { %v730_v47 = vand.u32 4294901760, %v729_v44  ;;  %604 = vmatmul.f32.vlgmr.msrb.gmra.mxu0 %v550_v45  ;;  %v551_v48 = vand.u32 4294901760, %v550_v45 }
 0x3c2   :  { %v731_v51 = vsub.f32 %v729_v44, %v730_v47  ;;  %628 = vmatmul.f32.vlgmr.msrb.gmra.mxu1 %v551_v48  ;;  %805 = vmatpush.xpose.msrb.mxu0 %v730_v47  ;;  %v552_v52 = vsub.f32 %v550_v45, %v551_v48 }
 0x3c4   :  { %v732_v54 = vand.u32 4294901760, %v731_v51  ;;  %v553_v57 = vand.u32 4294901760, %v552_v52 }
 0x3c6   :  { %554 = vmatmul.f32.vlgmr.msra.gmra.mxu2 %v553_v57  ;;  %674 = vmatmul.f32.vlgmr.msrb.gmra.mxu3 %v549_v41 }
 0x3c7   :  { %733 = vmatpush.xpose.msra.mxu1 %v732_v54  ;;  %756 = vmatpush.xpose.msra.mxu2 %v729_v44 }
 0x3c8   :  { %909 = vmatpush.msrb.mxu3 %v908_v60  ;;  %709 = vmatmul.f32.vlgmr.msra.gmra.mxu0 %v708_v62 }
 0x3c9   :  { %932 = vmatpush.msra.mxu0 %v905_v32 }
 0x3ca   :  { %735 = vmatmul.f32.vlgmr.msra.gmra.mxu1 %v704_v28 }
 0x3cb   :  { %827 = vmatpush.xpose.msrb.mxu1 %v702_v40 }
 0x3ce   :  { %652 = vmatmul.f32.vlgmr.msrb.gmra.mxu2 %v549_v41  ;;  %783 = vmatmul.f32.vlgmr.msra.gmra.mxu3 %v706_v46  ;;  %v1019_v41 = vsel %vm350_vm8, %v1016_v38, 0 }
 0x3cf   :  { %955 = vmatpush.msra.mxu1 %v878_v26  ;;  %879 = vmatpush.msrb.mxu2 %v878_v26  ;;  %v1040_v45 = vand.u32 4294901760, %v1019_v41 }
 0x3d0   :  { %1003 = vmatpush.msra.mxu3 %v878_v26  ;;  %807 = vmatmul.f32.vlgmr.msrb.gmra.mxu0 %v704_v28 }
 0x3d1   :  { %1039 = vmatpush.xpose.msrb.mxu0 %v4133_v49  ;;  %v1041_v51 = vsub.f32 %v1019_v41, %v1040_v45 }
 0x3d2   :  { %829 = vmatmul.f32.vlgmr.msrb.gmra.mxu1 %v704_v28 }
 0x3d3   :  { %1069 = vmatpush.xpose.msrb.mxu1 %v1068_v1  ;;  %v1042_v54 = vand.u32 4294901760, %v1041_v51 }
 0x3d5   :  { %v1043_v1 = vsub.f32 %v1041_v51, %v1042_v54 }
 0x3d6   :  { %759 = vmatmul.f32.vlgmr.msra.gmra.mxu2 %v705_v36 }
 0x3d7   :  { %981 = vmatpush.msra.mxu2 %v906_v42 }
 0x43d   :  { %v605_v3 = vpop.f32.mrf.mxu0 }
 0x43f   :  { %v629_v6 = vpop.f32.mrf.mxu1 }
 0x441   :  { %v581_v2 = vpop.f32.mrf.mxu3 }
 0x445   :  { %v710_v13 = vpop.f32.mrf.mxu0 }
 0x447   :  { %v736_v15 = vpop.f32.mrf.mxu1 }
 0x448   :  { %v737_v16 = vadd.f32 %v736_v15, %v710_v13 }
 0x449   :  { %v555_v4 = vpop.f32.mrf.mxu2  ;;  %v675_v9 = vpop.f32.mrf.mxu3 }
 0x44a   :  { %v582_v5 = vadd.f32 %v581_v2, %v555_v4 }
 0x44c   :  { %v606_v7 = vadd.f32 %v605_v3, %v582_v5 }
 0x44d   :  { %v808_v22 = vpop.f32.mrf.mxu0 }
 0x44e   :  { %v630_v8 = vadd.f32 %v629_v6, %v606_v7  ;;  %v1044_v6 = vand.u32 4294901760, %v1043_v1 }
 0x44f   :  { %v830_v25 = vpop.f32.mrf.mxu1 }
 0x451   :  { %v653_v11 = vpop.f32.mrf.mxu2  ;;  %v784_v20 = vpop.f32.mrf.mxu3 }
 0x452   :  { %v654_v12 = vadd.f32 %v653_v11, %v630_v8 }
 0x454   :  { %v676_v14 = vadd.f32 %v675_v9, %v654_v12 }
 0x456   :  { %678 = vst.msk [vmem:[#allocation2] sm:$0xff] %vm350_vm8, %v676_v14 }
 0x459   :  { %v760_v17 = vpop.f32.mrf.mxu2 }
 0x45a   :  { %v761_v19 = vadd.f32 %v760_v17, %v737_v16 }
 0x45c   :  { %v785_v21 = vadd.f32 %v784_v20, %v761_v19 }
 0x45e   :  { %v809_v24 = vadd.f32 %v808_v22, %v785_v21 }
 0x460   :  { %v831_v26 = vadd.f32 %v830_v25, %v809_v24 }
 0x462   :  { %v833_v27 = vsel %vm350_vm8, %v831_v26, -inf }
 0x463   :  { %834 = vmax.xlane.f32.xlu0 %v833_v27 }
 0x4d6   :  { %v835_v28 = vpop.xlane.xlu0 %834 }
 0x4d7   :  { %v836_v29 = vsub.f32 %v831_v26, %v835_v28 }
 0x4d9   :  { %v837_v30 = vmul.f32 1.442695, %v836_v29 }
 0x4db   :  { %3884 = vpow2.f32 %v837_v30 }
 0x4e1   :  { %v3885_v31 = vpop.eup %3884 }
 0x4e2   :  { %v839_v32 = vsel %vm350_vm8, %v3885_v31, 0.0 }
 0x4e3   :  { %840 = vadd.xlane.f32.xlu1 %v839_v32 }
 0x4fc   :  { %1193 = vrot.lane.b32.xlu1 %v4097_v34, %s4008_s21 }
 0x556   :  { %v841_v33 = vpop.xlane.xlu1 %840 }
 0x557   :  { %3886 = vrcp.f32 %v841_v33  ;;  %v853_v40 = vand.u32 2147483648, %v841_v33  ;;  %v851_v43 = vand.u32 2147483647, %v841_v33  ;;  %vm847_vm14 = vweird.f32 %v841_v33 }
 0x559   :  { %v854_v46 = vor.u32 1.1754944e-38, %v853_v40  ;;  %vm852_vm1 = vcmp.eq.f32.partialorder %v851_v43, 8.507059e+37  ;;  %v210_v40 = vadd.f32 %v4095_v23, %v4093_v18 }
 0x55b   :  { %v245_v41 = vadd.f32 %v4111_v55, %v210_v40 }
 0x55d   :  { %v3887_v36 = vpop.eup %3886 }
 0x55e   :  { %v843_v37 = vmul.f32 %v3887_v36, %v841_v33  ;;  %vm848_vm13 = vweird.f32 %v3887_v36 }
 0x55f   :  { %vm849_vm15 = vmor %vm847_vm14, %vm848_vm13 }
 0x560   :  { %v844_v39 = vsub.f32 1.0, %v843_v37 }
 0x562   :  { %v845_v42 = vmul.f32 %v3887_v36, %v844_v39 }
 0x564   :  { %v846_v44 = vadd.f32 %v3887_v36, %v845_v42  ;;  %v278_v42 = vadd.f32 %v4113_v56, %v245_v41 }
 0x566   :  { %v850_v47 = vsel %vm849_vm15, %v3887_v36, %v846_v44  ;;  %v315_v43 = vadd.f32 %v4115_v59, %v278_v42 }
 0x567   :  { %v855_v48 = vsel %vm852_vm1, %v854_v46, %v850_v47 }
 0x568   :  { %v856_v50 = vmul.f32 %v3885_v31, %v855_v48  ;;  %v4182_v44 = vadd.f32 %v4117_v61, %v315_v43 }
 0x56a   :  { %v861_v52 = vsel %vm350_vm8, %v856_v50, 0 }
 0x56b   :  { %v880_v53 = vand.u32 4294901760, %v861_v52 }
 0x56d   :  { %911 = vmatmul.f32.vlgmr.msrb.gmra.mxu3 %v880_v53  ;;  %v881_v57 = vsub.f32 %v861_v52, %v880_v53 }
 0x56e   :  { %1115 = vmatpush.xpose.msrb.mxu3 %v4133_v49  ;;  %v1194_v60 = vpop.permute.xlu1 %1193 }
 0x56f   :  { %v1214_v62 = vand.u32 4294901760, %v1194_v60  ;;  %935 = vmatmul.f32.vlgmr.msra.gmra.mxu0 %v881_v57  ;;  %v882_v0 = vand.u32 4294901760, %v881_v57 }
 0x570   :  { %1141 = vmatpush.xpose.msra.mxu0 %v1066_v63 }
 0x571   :  { %v1241_v2 = vsub.f32 %v1194_v60, %v1214_v62  ;;  %959 = vmatmul.f32.vlgmr.msra.gmra.mxu1 %v882_v0  ;;  %v883_v3 = vsub.f32 %v881_v57, %v882_v0 }
 0x572   :  { %1163 = vmatpush.xpose.msra.mxu1 %v4133_v49 }
 0x573   :  { %v1242_v4 = vand.u32 4294901760, %v1241_v2  ;;  %v884_v5 = vand.u32 4294901760, %v883_v3 }
 0x575   :  { %v1243_v7 = vsub.f32 %v1241_v2, %v1242_v4  ;;  %885 = vmatmul.f32.vlgmr.msrb.gmra.mxu2 %v884_v5  ;;  %1005 = vmatmul.f32.vlgmr.msra.gmra.mxu3 %v880_v53 }
 0x576   :  { %1092 = vmatpush.xpose.msrb.mxu2 %v4136_v58 }
 0x577   :  { %v1244_v8 = vand.u32 4294901760, %v1243_v7  ;;  %1045 = vmatmul.f32.vlgmr.msrb.gmra.mxu0 %v1044_v6 }
 0x578   :  { %1268 = vmatpush.msrb.mxu0 %v1241_v2 }
 0x579   :  { %1071 = vmatmul.f32.vlgmr.msrb.gmra.mxu1 %v1040_v45  ;;  %1245 = vmatpush.msra.mxu3 %v1244_v8 }
 0x57a   :  { %1291 = vmatpush.msrb.mxu1 %v1214_v62 }
 0x57d   :  { %983 = vmatmul.f32.vlgmr.msra.gmra.mxu2 %v880_v53  ;;  %1119 = vmatmul.f32.vlgmr.msrb.gmra.mxu3 %v1042_v54 }
 0x57e   :  { %1215 = vmatpush.msra.mxu2 %v1214_v62  ;;  %1339 = vmatpush.msrb.mxu3 %v1214_v62 }
 0x57f   :  { %1143 = vmatmul.f32.vlgmr.msra.gmra.mxu0 %v1040_v45 }
 0x581   :  { %1165 = vmatmul.f32.vlgmr.msra.gmra.mxu1 %v1040_v45 }
 0x585   :  { %1095 = vmatmul.f32.vlgmr.msrb.gmra.mxu2 %v1041_v51 }
 0x586   :  { %1317 = vmatpush.msrb.mxu2 %v1242_v4 }
 0x5ec   :  { %v4157_v63 = vpop.f32.mrf.mxu0 }
 0x5ee   :  { %v4161_v58 = vpop.f32.mrf.mxu1 }
 0x5f0   :  { %v4155_v49 = vpop.f32.mrf.mxu3 }
 0x5f4   :  { %v1046_v13 = vpop.f32.mrf.mxu0 }
 0x5f6   :  { %v1072_v14 = vpop.f32.mrf.mxu1 }
 0x5f7   :  { %v1073_v15 = vadd.f32 %v1072_v14, %v1046_v13 }
 0x5f8   :  { %v4159_v9 = vpop.f32.mrf.mxu2  ;;  %v4163_v11 = vpop.f32.mrf.mxu3 }
 0x5fc   :  { %v1144_v21 = vpop.f32.mrf.mxu0 }
 0x5fe   :  { %v1166_v24 = vpop.f32.mrf.mxu1 }
 0x600   :  { %v4165_v12 = vpop.f32.mrf.mxu2  ;;  %v1120_v19 = vpop.f32.mrf.mxu3 }
 0x608   :  { %v1096_v16 = vpop.f32.mrf.mxu2 }
 0x609   :  { %v1097_v17 = vadd.f32 %v1096_v16, %v1073_v15 }
 0x60b   :  { %v1121_v20 = vadd.f32 %v1120_v19, %v1097_v17 }
 0x60d   :  { %v1145_v22 = vadd.f32 %v1144_v21, %v1121_v20 }
 0x60f   :  { %v1167_v25 = vadd.f32 %v1166_v24, %v1145_v22 }
 0x611   :  { %v1169_v26 = vsel %vm350_vm8, %v1167_v25, -inf }
 0x612   :  { %1170 = vmax.xlane.f32.xlu0 %v1169_v26 }
 0x626   :  { %1353 = vrot.lane.b32.xlu0 %v4097_v34, %s4009_s22 }
 0x62e   :  { %1351 = vrot.lane.b32.xlu0 %v4104_v35, %s4010_s23 }
 0x685   :  { %v1171_v27 = vpop.xlane.xlu0 %1170 }
 0x686   :  { %v1172_v28 = vsub.f32 %v1167_v25, %v1171_v27 }
 0x688   :  { %v1173_v29 = vmul.f32 1.442695, %v1172_v28 }
 0x68a   :  { %3888 = vpow2.f32 %v1173_v29 }
 0x690   :  { %v3889_v30 = vpop.eup %3888 }
 0x691   :  { %v1175_v31 = vsel %vm350_vm8, %v3889_v30, 0.0 }
 0x692   :  { %1176 = vadd.xlane.f32.xlu2 %v1175_v31 }
 0x698   :  { %v1354_v32 = vpop.permute.xlu0 %1353 }
 0x699   :  { %v1357_v33 = vsel %vm350_vm8, %v1354_v32, 0 }
 0x69a   :  { %v1374_v36 = vand.u32 4294901760, %v1357_v33 }
 0x69c   :  { %v1401_v37 = vsub.f32 %v1357_v33, %v1374_v36  ;;  %1375 = vmatpush.xpose.msra.mxu0 %v1374_v36 }
 0x69e   :  { %v1402_v38 = vand.u32 4294901760, %v1401_v37 }
 0x6a0   :  { %v1403_v39 = vsub.f32 %v1401_v37, %v1402_v38  ;;  %v1352_v55 = vpop.permute.xlu0 %1351 }
 0x6a1   :  { %v1355_v48 = vsel %vm350_vm8, %v1352_v55, 0 }
 0x6a2   :  { %v1404_v35 = vand.u32 4294901760, %v1403_v39  ;;  %v1376_v51 = vand.u32 4294901760, %v1355_v48 }
 0x6a4   :  { %1405 = vmatpush.xpose.msra.mxu1 %v1404_v35  ;;  %v1377_v62 = vsub.f32 %v1355_v48, %v1376_v51 }
 0x6a6   :  { %v1378_v4 = vand.u32 4294901760, %v1377_v62 }
 0x6a8   :  { %v1379_v14 = vsub.f32 %v1377_v62, %v1378_v4 }
 0x6aa   :  { %1529 = vrot.lane.b32.xlu2 %v4097_v34, %s4011_s24  ;;  %v1380_v20 = vand.u32 4294901760, %v1379_v14 }
 0x6b2   :  { %1689 = vrot.lane.b32.xlu2 %v4182_v44, %s4002_s15 }
 0x705   :  { %v1177_v45 = vpop.xlane.xlu2 %1176 }
 0x706   :  { %3890 = vrcp.f32 %v1177_v45  ;;  %v1189_v56 = vand.u32 2147483648, %v1177_v45  ;;  %v1187_v34 = vand.u32 2147483647, %v1177_v45  ;;  %vm1183_vm3 = vweird.f32 %v1177_v45 }
 0x708   :  { %v1190_v52 = vor.u32 1.1754944e-38, %v1189_v56  ;;  %vm1188_vm5 = vcmp.eq.f32.partialorder %v1187_v34, 8.507059e+37 }
 0x70c   :  { %v3891_v18 = vpop.eup %3890 }
 0x70d   :  { %v1179_v23 = vmul.f32 %v3891_v18, %v1177_v45  ;;  %v1530_v47 = vpop.permute.xlu2 %1529  ;;  %vm1184_vm2 = vweird.f32 %v3891_v18 }
 0x70e   :  { %v1550_v61 = vand.u32 4294901760, %v1530_v47  ;;  %vm1185_vm4 = vmor %vm1183_vm3, %vm1184_vm2 }
 0x70f   :  { %v1180_v46 = vsub.f32 1.0, %v1179_v23 }
 0x710   :  { %v1577_v57 = vsub.f32 %v1530_v47, %v1550_v61 }
 0x711   :  { %v1181_v50 = vmul.f32 %v3891_v18, %v1180_v46 }
 0x712   :  { %v1578_v3 = vand.u32 4294901760, %v1577_v57 }
 0x713   :  { %v1182_v59 = vadd.f32 %v3891_v18, %v1181_v50 }
 0x714   :  { %v1579_v8 = vsub.f32 %v1577_v57, %v1578_v3 }
 0x715   :  { %v1186_v53 = vsel %vm1185_vm4, %v3891_v18, %v1182_v59  ;;  %v1690_v0 = vpop.permute.xlu2 %1689  ;;  %v4206_v59 = vmul.f32 0.35355338, %v4182_v44 }
 0x716   :  { %v1191_v54 = vsel %vm1188_vm5, %v1190_v52, %v1186_v53  ;;  %v1694_v5 = vsel %vm350_vm8, %v1690_v0, 0  ;;  %v1580_v17 = vand.u32 4294901760, %v1579_v8 }
 0x717   :  { %v1192_v60 = vmul.f32 %v3889_v30, %v1191_v54  ;;  %v4189_v13 = vand.u32 4294901760, %v1694_v5 }
 0x719   :  { %v1197_v1 = vsel %vm350_vm8, %v1192_v60, 0  ;;  %v4192_v19 = vsub.f32 %v1694_v5, %v4189_v13 }
 0x71a   :  { %v1216_v2 = vand.u32 4294901760, %v1197_v1 }
 0x71b   :  { %v1739_v21 = vand.u32 4294901760, %v4192_v19 }
 0x71c   :  { %1247 = vmatmul.f32.vlgmr.msra.gmra.mxu3 %v1216_v2  ;;  %v1217_v6 = vsub.f32 %v1197_v1, %v1216_v2 }
 0x71d   :  { %1451 = vmatpush.xpose.msra.mxu3 %v1374_v36  ;;  %v1740_v22 = vsub.f32 %v4192_v19, %v1739_v21 }
 0x71e   :  { %1271 = vmatmul.f32.vlgmr.msrb.gmra.mxu0 %v1217_v6  ;;  %v1218_v7 = vand.u32 4294901760, %v1217_v6 }
 0x71f   :  { %1477 = vmatpush.xpose.msrb.mxu0 %v1402_v38  ;;  %v1741_v24 = vand.u32 4294901760, %v1740_v22 }
 0x720   :  { %1295 = vmatmul.f32.vlgmr.msrb.gmra.mxu1 %v1218_v7  ;;  %v1219_v15 = vsub.f32 %v1217_v6, %v1218_v7 }
 0x721   :  { %1499 = vmatpush.xpose.msrb.mxu1 %v1374_v36 }
 0x722   :  { %v1220_v16 = vand.u32 4294901760, %v1219_v15 }
 0x724   :  { %1221 = vmatmul.f32.vlgmr.msra.gmra.mxu2 %v1220_v16  ;;  %1341 = vmatmul.f32.vlgmr.msrb.gmra.mxu3 %v1216_v2 }
 0x725   :  { %1428 = vmatpush.xpose.msra.mxu2 %v1401_v37  ;;  %1581 = vmatpush.msrb.mxu3 %v1580_v17 }
 0x726   :  { %1381 = vmatmul.f32.vlgmr.msra.gmra.mxu0 %v1380_v20 }
 0x727   :  { %1604 = vmatpush.msra.mxu0 %v1577_v57 }
 0x728   :  { %1407 = vmatmul.f32.vlgmr.msra.gmra.mxu1 %v1376_v51 }
 0x729   :  { %1627 = vmatpush.msra.mxu1 %v1550_v61 }
 0x72c   :  { %1319 = vmatmul.f32.vlgmr.msrb.gmra.mxu2 %v1216_v2  ;;  %1455 = vmatmul.f32.vlgmr.msra.gmra.mxu3 %v1378_v4 }
 0x72d   :  { %1551 = vmatpush.msrb.mxu2 %v1550_v61  ;;  %1675 = vmatpush.msra.mxu3 %v1550_v61 }
 0x72e   :  { %1479 = vmatmul.f32.vlgmr.msrb.gmra.mxu0 %v1376_v51 }
 0x72f   :  { %1712 = vmatpush.xpose.msrb.mxu0 %v4189_v13 }
 0x730   :  { %1501 = vmatmul.f32.vlgmr.msrb.gmra.mxu1 %v1376_v51 }
 0x731   :  { %1742 = vmatpush.xpose.msrb.mxu1 %v1741_v24 }
 0x734   :  { %1431 = vmatmul.f32.vlgmr.msra.gmra.mxu2 %v1377_v62  ;;  %v1692_v62 = vsel %vm350_vm8, %v4206_v59, 0 }
 0x735   :  { %1653 = vmatpush.msra.mxu2 %v1578_v3  ;;  %v1713_v2 = vand.u32 4294901760, %v1692_v62 }
 0x737   :  { %v1714_v7 = vsub.f32 %v1692_v62, %v1713_v2 }
 0x739   :  { %v1715_v20 = vand.u32 4294901760, %v1714_v7 }
 0x79b   :  { %v1272_v26 = vpop.f32.mrf.mxu0 }
 0x79d   :  { %v1296_v29 = vpop.f32.mrf.mxu1 }
 0x79f   :  { %v1248_v25 = vpop.f32.mrf.mxu3 }
 0x7a3   :  { %v1382_v37 = vpop.f32.mrf.mxu0 }
 0x7a5   :  { %v1408_v39 = vpop.f32.mrf.mxu1 }
 0x7a6   :  { %v1409_v40 = vadd.f32 %v1408_v39, %v1382_v37 }
 0x7a7   :  { %v1222_v27 = vpop.f32.mrf.mxu2  ;;  %v1342_v32 = vpop.f32.mrf.mxu3 }
 0x7a8   :  { %v1249_v28 = vadd.f32 %v1248_v25, %v1222_v27  ;;  %v1716_v27 = vsub.f32 %v1714_v7, %v1715_v20 }
 0x7aa   :  { %v1273_v30 = vadd.f32 %v1272_v26, %v1249_v28 }
 0x7ab   :  { %v1480_v45 = vpop.f32.mrf.mxu0 }
 0x7ac   :  { %v1297_v31 = vadd.f32 %v1296_v29, %v1273_v30  ;;  %v1717_v30 = vand.u32 4294901760, %v1716_v27 }
 0x7ad   :  { %v1502_v23 = vpop.f32.mrf.mxu1 }
 0x7af   :  { %v1320_v33 = vpop.f32.mrf.mxu2  ;;  %v1456_v42 = vpop.f32.mrf.mxu3 }
 0x7b0   :  { %v1321_v36 = vadd.f32 %v1320_v33, %v1297_v31 }
 0x7b2   :  { %v4199_v38 = vadd.f32 %v1342_v32, %v1321_v36 }
 0x7b7   :  { %v1432_v35 = vpop.f32.mrf.mxu2 }
 0x7b8   :  { %v1433_v41 = vadd.f32 %v1432_v35, %v1409_v40 }
 0x7ba   :  { %v1457_v43 = vadd.f32 %v1456_v42, %v1433_v41 }
 0x7bc   :  { %v1481_v18 = vadd.f32 %v1480_v45, %v1457_v43 }
 0x7be   :  { %v1503_v55 = vadd.f32 %v1502_v23, %v1481_v18 }
 0x7c0   :  { %v1505_v46 = vsel %vm350_vm8, %v1503_v55, -inf }
 0x7c1   :  { %1506 = vmax.xlane.f32.xlu1 %v1505_v46 }
 0x834   :  { %v1507_v47 = vpop.xlane.xlu1 %1506 }
 0x835   :  { %v1508_v56 = vsub.f32 %v1503_v55, %v1507_v47 }
 0x837   :  { %v1509_v48 = vmul.f32 1.442695, %v1508_v56 }
 0x839   :  { %3892 = vpow2.f32 %v1509_v48 }
 0x83f   :  { %v3893_v50 = vpop.eup %3892 }
 0x840   :  { %v1511_v34 = vsel %vm350_vm8, %v3893_v50, 0.0 }
 0x841   :  { %1512 = vadd.xlane.f32.xlu0 %v1511_v34 }
 0x855   :  { %1866 = vrot.lane.b32.xlu0 %v4182_v44, %s4001_s1 }
 0x85d   :  { %2019 = vrot.lane.b32.xlu0 %v4206_v59, %s4003_s16 }
 0x8b4   :  { %v1513_v61 = vpop.xlane.xlu0 %1512 }
 0x8b5   :  { %3894 = vrcp.f32 %v1513_v61  ;;  %v1525_v54 = vand.u32 2147483648, %v1513_v61  ;;  %v1523_v60 = vand.u32 2147483647, %v1513_v61  ;;  %vm1519_vm7 = vweird.f32 %v1513_v61 }
 0x8b7   :  { %v1526_v1 = vor.u32 1.1754944e-38, %v1525_v54  ;;  %vm1524_vm10 = vcmp.eq.f32.partialorder %v1523_v60, 8.507059e+37 }
 0x8bb   :  { %v3895_v51 = vpop.eup %3894 }
 0x8bc   :  { %v1515_v52 = vmul.f32 %v3895_v51, %v1513_v61  ;;  %vm1520_vm6 = vweird.f32 %v3895_v51 }
 0x8bd   :  { %vm1521_vm9 = vmor %vm1519_vm7, %vm1520_vm6  ;;  %vm1013_vm6 = vcmask 130112  }
 0x8be   :  { %v1516_v53 = vsub.f32 1.0, %v1515_v52 }
 0x8c0   :  { %v1517_v57 = vmul.f32 %v3895_v51, %v1516_v53 }
 0x8c2   :  { %v1518_v0 = vadd.f32 %v3895_v51, %v1517_v57 }
 0x8c4   :  { %v1522_v3 = vsel %vm1521_vm9, %v3895_v51, %v1518_v0 }
 0x8c5   :  { %v1527_v4 = vsel %vm1524_vm10, %v1526_v1, %v1522_v3  ;;  %vm1349_vm10 = vcmask 195712  }
 0x8c6   :  { %v1528_v5 = vmul.f32 %v3893_v50, %v1527_v4 }
 0x8c7   :  { %v1867_v6 = vpop.permute.xlu0 %1866 }
 0x8c8   :  { %v1887_v8 = vand.u32 4294901760, %v1867_v6  ;;  %v1533_v14 = vsel %vm350_vm8, %v1528_v5, 0 }
 0x8c9   :  { %v1552_v15 = vand.u32 4294901760, %v1533_v14 }
 0x8ca   :  { %v1914_v16 = vsub.f32 %v1867_v6, %v1887_v8 }
 0x8cb   :  { %1583 = vmatmul.f32.vlgmr.msrb.gmra.mxu3 %v1552_v15  ;;  %v1553_v17 = vsub.f32 %v1533_v14, %v1552_v15 }
 0x8cc   :  { %v1915_v22 = vand.u32 4294901760, %v1914_v16  ;;  %1788 = vmatpush.xpose.msrb.mxu3 %v4189_v13 }
 0x8cd   :  { %1607 = vmatmul.f32.vlgmr.msra.gmra.mxu0 %v1553_v17  ;;  %v1554_v24 = vand.u32 4294901760, %v1553_v17 }
 0x8ce   :  { %v1916_v25 = vsub.f32 %v1914_v16, %v1915_v22  ;;  %1814 = vmatpush.xpose.msra.mxu0 %v1739_v21 }
 0x8cf   :  { %1631 = vmatmul.f32.vlgmr.msra.gmra.mxu1 %v1554_v24  ;;  %v1555_v26 = vsub.f32 %v1553_v17, %v1554_v24  ;;  %v2020_v6 = vpop.permute.xlu0 %2019 }
 0x8d0   :  { %v1917_v28 = vand.u32 4294901760, %v1916_v25  ;;  %1836 = vmatpush.xpose.msra.mxu1 %v4189_v13 }
 0x8d1   :  { %v1556_v29 = vand.u32 4294901760, %v1555_v26 }
 0x8d3   :  { %1557 = vmatmul.f32.vlgmr.msrb.gmra.mxu2 %v1556_v29  ;;  %1677 = vmatmul.f32.vlgmr.msra.gmra.mxu3 %v1552_v15 }
 0x8d4   :  { %1765 = vmatpush.xpose.msrb.mxu2 %v4192_v19  ;;  %1918 = vmatpush.msra.mxu3 %v1917_v28 }
 0x8d5   :  { %1718 = vmatmul.f32.vlgmr.msrb.gmra.mxu0 %v1717_v30 }
 0x8d6   :  { %1941 = vmatpush.msrb.mxu0 %v1914_v16 }
 0x8d7   :  { %1744 = vmatmul.f32.vlgmr.msrb.gmra.mxu1 %v1713_v2 }
 0x8d8   :  { %1964 = vmatpush.msrb.mxu1 %v1887_v8 }
 0x8db   :  { %1655 = vmatmul.f32.vlgmr.msra.gmra.mxu2 %v1552_v15  ;;  %1792 = vmatmul.f32.vlgmr.msrb.gmra.mxu3 %v1715_v20  ;;  %v2023_v15 = vsel %vm350_vm8, %v2020_v6, 0 }
 0x8dc   :  { %1888 = vmatpush.msra.mxu2 %v1887_v8  ;;  %2012 = vmatpush.msrb.mxu3 %v1887_v8  ;;  %v2044_v24 = vand.u32 4294901760, %v2023_v15 }
 0x8dd   :  { %1816 = vmatmul.f32.vlgmr.msra.gmra.mxu0 %v1713_v2 }
 0x8de   :  { %v2045_v30 = vsub.f32 %v2023_v15, %v2044_v24 }
 0x8df   :  { %1838 = vmatmul.f32.vlgmr.msra.gmra.mxu1 %v1713_v2 }
 0x8e3   :  { %1768 = vmatmul.f32.vlgmr.msrb.gmra.mxu2 %v1714_v7 }
 0x8e4   :  { %1990 = vmatpush.msrb.mxu2 %v1915_v22 }
 0x94a   :  { %v1608_v21 = vpop.f32.mrf.mxu0 }
 0x94c   :  { %v1632_v33 = vpop.f32.mrf.mxu1 }
 0x94e   :  { %v1584_v13 = vpop.f32.mrf.mxu3 }
 0x952   :  { %v1719_v35 = vpop.f32.mrf.mxu0 }
 0x954   :  { %v1745_v42 = vpop.f32.mrf.mxu1 }
 0x955   :  { %v1746_v43 = vadd.f32 %v1745_v42, %v1719_v35 }
 0x956   :  { %v1558_v31 = vpop.f32.mrf.mxu2  ;;  %v1678_v37 = vpop.f32.mrf.mxu3 }
 0x957   :  { %v1585_v32 = vadd.f32 %v1584_v13, %v1558_v31 }
 0x959   :  { %v1609_v36 = vadd.f32 %v1608_v21, %v1585_v32 }
 0x95a   :  { %v1817_v46 = vpop.f32.mrf.mxu0 }
 0x95b   :  { %v1633_v19 = vadd.f32 %v1632_v33, %v1609_v36  ;;  %v2046_v33 = vand.u32 4294901760, %v2045_v30 }
 0x95c   :  { %v1839_v56 = vpop.f32.mrf.mxu1 }
 0x95d   :  { %v2047_v35 = vsub.f32 %v2045_v30, %v2046_v33 }
 0x95e   :  { %v1656_v39 = vpop.f32.mrf.mxu2  ;;  %v1793_v23 = vpop.f32.mrf.mxu3 }
 0x95f   :  { %v1657_v40 = vadd.f32 %v1656_v39, %v1633_v19 }
 0x961   :  { %v4218_v41 = vadd.f32 %v1678_v37, %v1657_v40 }
 0x966   :  { %v1769_v45 = vpop.f32.mrf.mxu2 }
 0x967   :  { %v1770_v18 = vadd.f32 %v1769_v45, %v1746_v43 }
 0x969   :  { %v1794_v55 = vadd.f32 %v1793_v23, %v1770_v18  ;;  %v2048_v23 = vand.u32 4294901760, %v2047_v35 }
 0x96b   :  { %v1818_v47 = vadd.f32 %v1817_v46, %v1794_v55 }
 0x96d   :  { %v1840_v48 = vadd.f32 %v1839_v56, %v1818_v47 }
 0x96f   :  { %v1842_v50 = vsel %vm350_vm8, %v1840_v48, -inf }
 0x970   :  { %1843 = vmax.xlane.f32.xlu1 %v1842_v50 }
 0x989   :  { %2021 = vrot.lane.b32.xlu1 %v4182_v44, %s4007_s20 }
 0x9e3   :  { %v1844_v34 = vpop.xlane.xlu1 %1843 }
 0x9e4   :  { %v1845_v61 = vsub.f32 %v1840_v48, %v1844_v34 }
 0x9e6   :  { %v1846_v51 = vmul.f32 1.442695, %v1845_v61 }
 0x9e8   :  { %3896 = vpow2.f32 %v1846_v51 }
 0x9ee   :  { %v3897_v52 = vpop.eup %3896 }
 0x9ef   :  { %v1848_v53 = vsel %vm350_vm8, %v3897_v52, 0.0 }
 0x9f0   :  { %1849 = vadd.xlane.f32.xlu2 %v1848_v53 }
 0x9fb   :  { %v2022_v54 = vpop.permute.xlu1 %2021 }
 0x9fc   :  { %v2025_v57 = vsel %vm350_vm8, %v2022_v54, 0 }
 0x9fd   :  { %v2042_v60 = vand.u32 4294901760, %v2025_v57 }
 0x9ff   :  { %v2069_v62 = vsub.f32 %v2025_v57, %v2042_v60  ;;  %2043 = vmatpush.xpose.msra.mxu0 %v2042_v60 }
 0xa01   :  { %v2070_v0 = vand.u32 4294901760, %v2069_v62 }
 0xa03   :  { %v2071_v1 = vsub.f32 %v2069_v62, %v2070_v0 }
 0xa05   :  { %v2072_v2 = vand.u32 4294901760, %v2071_v1 }
 0xa07   :  { %2073 = vmatpush.xpose.msra.mxu1 %v2072_v2 }
 0xa08   :  { %2197 = vrot.lane.b32.xlu2 %v4182_v44, %s4004_s17 }
 0xa10   :  { %2356 = vrot.lane.b32.xlu2 %v4182_v44, %s4005_s18 }
 0xa63   :  { %v1850_v3 = vpop.xlane.xlu2 %1849 }
 0xa64   :  { %3898 = vrcp.f32 %v1850_v3  ;;  %v1862_v14 = vand.u32 2147483648, %v1850_v3  ;;  %v1860_v17 = vand.u32 2147483647, %v1850_v3  ;;  %vm1856_vm12 = vweird.f32 %v1850_v3 }
 0xa66   :  { %v1863_v25 = vor.u32 1.1754944e-38, %v1862_v14  ;;  %vm1861_vm14 = vcmp.eq.f32.partialorder %v1860_v17, 8.507059e+37 }
 0xa6a   :  { %v3899_v4 = vpop.eup %3898 }
 0xa6b   :  { %v1852_v5 = vmul.f32 %v3899_v4, %v1850_v3  ;;  %v2198_v8 = vpop.permute.xlu2 %2197  ;;  %vm1857_vm11 = vweird.f32 %v3899_v4 }
 0xa6c   :  { %v2218_v22 = vand.u32 4294901760, %v2198_v8  ;;  %vm1858_vm13 = vmor %vm1856_vm12, %vm1857_vm11  ;;  %vm1685_vm11 = vcmask 261312  }
 0xa6d   :  { %v1853_v7 = vsub.f32 1.0, %v1852_v5 }
 0xa6e   :  { %v2245_v28 = vsub.f32 %v2198_v8, %v2218_v22 }
 0xa6f   :  { %v1854_v16 = vmul.f32 %v3899_v4, %v1853_v7 }
 0xa70   :  { %v2246_v32 = vand.u32 4294901760, %v2245_v28 }
 0xa71   :  { %v1855_v20 = vadd.f32 %v3899_v4, %v1854_v16 }
 0xa72   :  { %v2247_v39 = vsub.f32 %v2245_v28, %v2246_v32 }
 0xa73   :  { %v1859_v26 = vsel %vm1858_vm13, %v3899_v4, %v1855_v20  ;;  %v2357_v13 = vpop.permute.xlu2 %2356 }
 0xa74   :  { %v1864_v27 = vsel %vm1861_vm14, %v1863_v25, %v1859_v26  ;;  %v2360_v36 = vsel %vm350_vm8, %v2357_v13, 0  ;;  %v2248_v45 = vand.u32 4294901760, %v2247_v39 }
 0xa75   :  { %v1865_v29 = vmul.f32 %v3897_v52, %v1864_v27  ;;  %v4232_v40 = vand.u32 4294901760, %v2360_v36 }
 0xa77   :  { %v1870_v21 = vsel %vm350_vm8, %v1865_v29, 0  ;;  %v4235_v18 = vsub.f32 %v2360_v36, %v4232_v40 }
 0xa78   :  { %v1889_v31 = vand.u32 4294901760, %v1870_v21 }
 0xa79   :  { %v2405_v55 = vand.u32 4294901760, %v4235_v18 }
 0xa7a   :  { %1920 = vmatmul.f32.vlgmr.msra.gmra.mxu3 %v1889_v31  ;;  %v1890_v19 = vsub.f32 %v1870_v21, %v1889_v31 }
 0xa7b   :  { %2119 = vmatpush.xpose.msra.mxu3 %v2042_v60  ;;  %v2406_v46 = vsub.f32 %v4235_v18, %v2405_v55 }
 0xa7c   :  { %1944 = vmatmul.f32.vlgmr.msrb.gmra.mxu0 %v1890_v19  ;;  %v1891_v37 = vand.u32 4294901760, %v1890_v19 }
 0xa7d   :  { %2145 = vmatpush.xpose.msrb.mxu0 %v2070_v0  ;;  %v2407_v47 = vand.u32 4294901760, %v2406_v46 }
 0xa7e   :  { %1968 = vmatmul.f32.vlgmr.msrb.gmra.mxu1 %v1891_v37  ;;  %v1892_v42 = vsub.f32 %v1890_v19, %v1891_v37 }
 0xa7f   :  { %2167 = vmatpush.xpose.msrb.mxu1 %v2042_v60 }
 0xa80   :  { %v1893_v43 = vand.u32 4294901760, %v1892_v42 }
 0xa82   :  { %1894 = vmatmul.f32.vlgmr.msra.gmra.mxu2 %v1893_v43  ;;  %2014 = vmatmul.f32.vlgmr.msrb.gmra.mxu3 %v1889_v31 }
 0xa83   :  { %2096 = vmatpush.xpose.msra.mxu2 %v2069_v62  ;;  %2249 = vmatpush.msrb.mxu3 %v2248_v45 }
 0xa84   :  { %2049 = vmatmul.f32.vlgmr.msra.gmra.mxu0 %v2048_v23 }
 0xa85   :  { %2272 = vmatpush.msra.mxu0 %v2245_v28 }
 0xa86   :  { %2075 = vmatmul.f32.vlgmr.msra.gmra.mxu1 %v2044_v24 }
 0xa87   :  { %2295 = vmatpush.msra.mxu1 %v2218_v22 }
 0xa8a   :  { %1992 = vmatmul.f32.vlgmr.msrb.gmra.mxu2 %v1889_v31  ;;  %2123 = vmatmul.f32.vlgmr.msra.gmra.mxu3 %v2046_v33 }
 0xa8b   :  { %2219 = vmatpush.msrb.mxu2 %v2218_v22  ;;  %2343 = vmatpush.msra.mxu3 %v2218_v22 }
 0xa8c   :  { %2147 = vmatmul.f32.vlgmr.msrb.gmra.mxu0 %v2044_v24 }
 0xa8d   :  { %2378 = vmatpush.xpose.msrb.mxu0 %v4232_v40 }
 0xa8e   :  { %2169 = vmatmul.f32.vlgmr.msrb.gmra.mxu1 %v2044_v24 }
 0xa8f   :  { %2408 = vmatpush.xpose.msrb.mxu1 %v2407_v47 }
 0xa92   :  { %2099 = vmatmul.f32.vlgmr.msra.gmra.mxu2 %v2045_v30 }
 0xa93   :  { %2321 = vmatpush.msra.mxu2 %v2246_v32 }
 0xaf9   :  { %v1945_v48 = vpop.f32.mrf.mxu0 }
 0xafb   :  { %v1969_v61 = vpop.f32.mrf.mxu1 }
 0xafd   :  { %v1921_v56 = vpop.f32.mrf.mxu3 }
 0xb01   :  { %v2050_v60 = vpop.f32.mrf.mxu0 }
 0xb03   :  { %v2076_v0 = vpop.f32.mrf.mxu1 }
 0xb04   :  { %v2077_v1 = vadd.f32 %v2076_v0, %v2050_v60 }
 0xb05   :  { %v1895_v50 = vpop.f32.mrf.mxu2  ;;  %v2015_v53 = vpop.f32.mrf.mxu3 }
 0xb06   :  { %v1922_v34 = vadd.f32 %v1921_v56, %v1895_v50 }
 0xb08   :  { %v1946_v51 = vadd.f32 %v1945_v48, %v1922_v34 }
 0xb09   :  { %v2148_v6 = vpop.f32.mrf.mxu0 }
 0xb0a   :  { %v1970_v52 = vadd.f32 %v1969_v61, %v1946_v51 }
 0xb0b   :  { %v2170_v8 = vpop.f32.mrf.mxu1 }
 0xb0d   :  { %v1993_v54 = vpop.f32.mrf.mxu2  ;;  %v2124_v4 = vpop.f32.mrf.mxu3 }
 0xb0e   :  { %v1994_v57 = vadd.f32 %v1993_v54, %v1970_v52 }
 0xb10   :  { %v2016_v62 = vadd.f32 %v2015_v53, %v1994_v57 }
 0xb12   :  { %2018 = vst.msk [vmem:[#allocation2 + $0x8] sm:$0xff] %vm350_vm8, %v2016_v62 }
 0xb15   :  { %v2100_v2 = vpop.f32.mrf.mxu2 }
 0xb16   :  { %v2101_v3 = vadd.f32 %v2100_v2, %v2077_v1 }
 0xb18   :  { %v2125_v5 = vadd.f32 %v2124_v4, %v2101_v3 }
 0xb1a   :  { %v2149_v7 = vadd.f32 %v2148_v6, %v2125_v5 }
 0xb1c   :  { %v2171_v14 = vadd.f32 %v2170_v8, %v2149_v7 }
 0xb1e   :  { %v2173_v15 = vsel %vm350_vm8, %v2171_v14, -inf }
 0xb1f   :  { %2174 = vmax.xlane.f32.xlu1 %v2173_v15 }
 0xb38   :  { %2354 = vrot.lane.b32.xlu1 %v4206_v59, %s4006_s19 }
 0xb40   :  { %2691 = vrot.lane.b32.xlu1 %v4182_v44, %s4009_s22 }
 0xb92   :  { %v2175_v16 = vpop.xlane.xlu1 %2174 }
 0xb93   :  { %v2176_v17 = vsub.f32 %v2171_v14, %v2175_v16 }
 0xb95   :  { %v2177_v20 = vmul.f32 1.442695, %v2176_v17 }
 0xb97   :  { %3900 = vpow2.f32 %v2177_v20 }
 0xb9d   :  { %v3901_v22 = vpop.eup %3900 }
 0xb9e   :  { %v2179_v24 = vsel %vm350_vm8, %v3901_v22, 0.0 }
 0xb9f   :  { %2180 = vadd.xlane.f32.xlu0 %v2179_v24 }
 0xbaa   :  { %v2355_v28 = vpop.permute.xlu1 %2354 }
 0xbab   :  { %v2358_v13 = vsel %vm350_vm8, %v2355_v28, 0 }
 0xbac   :  { %v2379_v33 = vand.u32 4294901760, %v2358_v13 }
 0xbae   :  { %v2380_v35 = vsub.f32 %v2358_v13, %v2379_v33 }
 0xbb0   :  { %v2381_v45 = vand.u32 4294901760, %v2380_v35 }
 0xbb2   :  { %v2382_v47 = vsub.f32 %v2380_v35, %v2381_v45  ;;  %v2692_v16 = vpop.permute.xlu1 %2691 }
 0xbb4   :  { %v2383_v50 = vand.u32 4294901760, %v2382_v47 }
 0xc12   :  { %v2181_v25 = vpop.xlane.xlu0 %2180 }
 0xc13   :  { %3902 = vrcp.f32 %v2181_v25  ;;  %v2193_v30 = vand.u32 2147483648, %v2181_v25  ;;  %v2191_v31 = vand.u32 2147483647, %v2181_v25  ;;  %vm2187_vm1 = vweird.f32 %v2181_v25 }
 0xc15   :  { %v2194_v36 = vor.u32 1.1754944e-38, %v2193_v30  ;;  %vm2192_vm3 = vcmp.eq.f32.partialorder %v2191_v31, 8.507059e+37 }
 0xc19   :  { %v3903_v26 = vpop.eup %3902 }
 0xc1a   :  { %v2183_v27 = vmul.f32 %v3903_v26, %v2181_v25  ;;  %vm2188_vm15 = vweird.f32 %v3903_v26 }
 0xc1b   :  { %vm2189_vm2 = vmor %vm2187_vm1, %vm2188_vm15 }
 0xc1c   :  { %v2184_v29 = vsub.f32 1.0, %v2183_v27 }
 0xc1e   :  { %v2185_v21 = vmul.f32 %v3903_v26, %v2184_v29 }
 0xc20   :  { %v2186_v32 = vadd.f32 %v3903_v26, %v2185_v21 }
 0xc22   :  { %v2190_v19 = vsel %vm2189_vm2, %v3903_v26, %v2186_v32 }
 0xc23   :  { %v2195_v37 = vsel %vm2192_vm3, %v2194_v36, %v2190_v19  ;;  %v913_v19 = vadd.f32 %v4155_v49, %v4159_v9 }
 0xc24   :  { %v2196_v39 = vmul.f32 %v3901_v22, %v2195_v37  ;;  %v2695_v22 = vsel %vm350_vm8, %v2692_v16, 0 }
 0xc25   :  { %v4264_v25 = vand.u32 4294901760, %v2695_v22  ;;  %v937_v37 = vadd.f32 %v4157_v63, %v913_v19 }
 0xc26   :  { %v2201_v42 = vsel %vm350_vm8, %v2196_v39, 0 }
 0xc27   :  { %v2220_v43 = vand.u32 4294901760, %v2201_v42  ;;  %v4267_v26 = vsub.f32 %v2695_v22, %v4264_v25  ;;  %v961_v39 = vadd.f32 %v4161_v58, %v937_v37 }
 0xc29   :  { %2251 = vmatmul.f32.vlgmr.msrb.gmra.mxu3 %v2220_v43  ;;  %v2221_v23 = vsub.f32 %v2201_v42, %v2220_v43  ;;  %v2740_v29 = vand.u32 4294901760, %v4267_v26 }
 0xc2a   :  { %2454 = vmatpush.xpose.msrb.mxu3 %v4232_v40 }
 0xc2b   :  { %2275 = vmatmul.f32.vlgmr.msra.gmra.mxu0 %v2221_v23  ;;  %v2222_v46 = vand.u32 4294901760, %v2221_v23 }
 0xc2c   :  { %2480 = vmatpush.xpose.msra.mxu0 %v2405_v55 }
 0xc2d   :  { %2299 = vmatmul.f32.vlgmr.msra.gmra.mxu1 %v2222_v46  ;;  %v2223_v56 = vsub.f32 %v2221_v23, %v2222_v46 }
 0xc2e   :  { %2502 = vmatpush.xpose.msra.mxu1 %v4232_v40 }
 0xc2f   :  { %v2224_v48 = vand.u32 4294901760, %v2223_v56 }
 0xc31   :  { %2225 = vmatmul.f32.vlgmr.msrb.gmra.mxu2 %v2224_v48  ;;  %2345 = vmatmul.f32.vlgmr.msra.gmra.mxu3 %v2220_v43 }
 0xc32   :  { %2431 = vmatpush.xpose.msrb.mxu2 %v4235_v18 }
 0xc33   :  { %2384 = vmatmul.f32.vlgmr.msrb.gmra.mxu0 %v2383_v50 }
 0xc35   :  { %2410 = vmatmul.f32.vlgmr.msrb.gmra.mxu1 %v2379_v33 }
 0xc39   :  { %2323 = vmatmul.f32.vlgmr.msra.gmra.mxu2 %v2220_v43  ;;  %2458 = vmatmul.f32.vlgmr.msrb.gmra.mxu3 %v2381_v45 }
 0xc3b   :  { %2482 = vmatmul.f32.vlgmr.msra.gmra.mxu0 %v2379_v33 }
 0xc3d   :  { %2504 = vmatmul.f32.vlgmr.msra.gmra.mxu1 %v2379_v33 }
 0xc41   :  { %2434 = vmatmul.f32.vlgmr.msrb.gmra.mxu2 %v2380_v35  ;;  %v985_v35 = vadd.f32 %v4165_v12, %v961_v39 }
 0xc43   :  { %v1007_v42 = vadd.f32 %v4163_v11, %v985_v35 }
 0xca8   :  { %v2276_v55 = vpop.f32.mrf.mxu0 }
 0xcaa   :  { %v2300_v52 = vpop.f32.mrf.mxu1 }
 0xcac   :  { %v2252_v34 = vpop.f32.mrf.mxu3 }
 0xcb0   :  { %v2385_v62 = vpop.f32.mrf.mxu0 }
 0xcb2   :  { %v2411_v18 = vpop.f32.mrf.mxu1 }
 0xcb3   :  { %v2412_v1 = vadd.f32 %v2411_v18, %v2385_v62 }
 0xcb4   :  { %v2226_v61 = vpop.f32.mrf.mxu2  ;;  %v2346_v54 = vpop.f32.mrf.mxu3 }
 0xcb5   :  { %v2253_v51 = vadd.f32 %v2252_v34, %v2226_v61 }
 0xcb7   :  { %v2277_v53 = vadd.f32 %v2276_v55, %v2253_v51 }
 0xcb8   :  { %v2483_v6 = vpop.f32.mrf.mxu0 }
 0xcb9   :  { %v2301_v40 = vadd.f32 %v2300_v52, %v2277_v53 }
 0xcba   :  { %v2505_v8 = vpop.f32.mrf.mxu1 }
 0xcbc   :  { %v2324_v57 = vpop.f32.mrf.mxu2  ;;  %v2459_v4 = vpop.f32.mrf.mxu3 }
 0xcbd   :  { %v2325_v60 = vadd.f32 %v2324_v57, %v2301_v40 }
 0xcbf   :  { %v4256_v0 = vadd.f32 %v2346_v54, %v2325_v60 }
 0xcc4   :  { %v2435_v2 = vpop.f32.mrf.mxu2 }
 0xcc5   :  { %v2436_v3 = vadd.f32 %v2435_v2, %v2412_v1 }
 0xcc7   :  { %v2460_v5 = vadd.f32 %v2459_v4, %v2436_v3 }
 0xcc9   :  { %v2484_v7 = vadd.f32 %v2483_v6, %v2460_v5 }
 0xccb   :  { %v2506_v14 = vadd.f32 %v2505_v8, %v2484_v7 }
 0xccd   :  { %v2508_v15 = vsel %vm350_vm8, %v2506_v14, -inf }
 0xcce   :  { %2509 = vmax.xlane.f32.xlu0 %v2508_v15 }
 0xce2   :  { %2532 = vrot.lane.b32.xlu0 %v4182_v44, %s4008_s21 }
 0xcea   :  { %2689 = vrot.lane.b32.xlu0 %v4206_v59, %s4010_s23  ;;  %v2741_v59 = vsub.f32 %v4267_v26, %v2740_v29 }
 0xcec   :  { %v2742_v21 = vand.u32 4294901760, %v2741_v59 }
 0xd41   :  { %v2510_v17 = vpop.xlane.xlu0 %2509 }
 0xd42   :  { %v2511_v20 = vsub.f32 %v2506_v14, %v2510_v17 }
 0xd44   :  { %v2512_v24 = vmul.f32 1.442695, %v2511_v20 }
 0xd46   :  { %3904 = vpow2.f32 %v2512_v24 }
 0xd4c   :  { %v3905_v27 = vpop.eup %3904 }
 0xd4d   :  { %v2514_v28 = vsel %vm350_vm8, %v3905_v27, 0.0 }
 0xd4e   :  { %2515 = vadd.xlane.f32.xlu2 %v2514_v28 }
 0xd54   :  { %v2533_v30 = vpop.permute.xlu0 %2532 }
 0xd55   :  { %v2553_v13 = vand.u32 4294901760, %v2533_v30 }
 0xd57   :  { %v2580_v31 = vsub.f32 %v2533_v30, %v2553_v13  ;;  %2554 = vmatpush.msra.mxu2 %v2553_v13  ;;  %2630 = vmatpush.msrb.mxu1 %v2553_v13 }
 0xd59   :  { %2743 = vmatpush.xpose.msra.mxu1 %v2742_v21  ;;  %v2581_v32 = vand.u32 4294901760, %v2580_v31  ;;  %2607 = vmatpush.msrb.mxu0 %v2580_v31 }
 0xd5b   :  { %2713 = vmatpush.xpose.msra.mxu0 %v4264_v25  ;;  %v2582_v33 = vsub.f32 %v2580_v31, %v2581_v32  ;;  %2656 = vmatpush.msrb.mxu2 %v2581_v32 }
 0xd5c   :  { %v2690_v45 = vpop.permute.xlu0 %2689 }
 0xd5d   :  { %v2583_v36 = vand.u32 4294901760, %v2582_v33 }
 0xd5f   :  { %2584 = vmatpush.msra.mxu3 %v2583_v36 }
 0xd61   :  { %2678 = vmatpush.msrb.mxu3 %v2553_v13 }
 0xd66   :  { %2867 = vrot.lane.b32.xlu2 %v4182_v44, %s4011_s24  ;;  %v2693_v44 = vsel %vm350_vm8, %v2690_v45, 0 }
 0xd67   :  { %v2714_v56 = vand.u32 4294901760, %v2693_v44 }
 0xd69   :  { %v2715_v51 = vsub.f32 %v2693_v44, %v2714_v56 }
 0xd6b   :  { %v2716_v54 = vand.u32 4294901760, %v2715_v51 }
 0xd6d   :  { %v2717_v18 = vsub.f32 %v2715_v51, %v2716_v54 }
 0xd6e   :  { %1010 = vrot.lane.b32.xlu2 %v1007_v42, %s3998_s30 }
 0xd6f   :  { %v2718_v4 = vand.u32 4294901760, %v2717_v18 }
 0xd76   :  { %1682 = vrot.lane.b32.xlu2 %v4218_v41, %s4012_s25 }
 0xdc1   :  { %v2516_v49 = vpop.xlane.xlu2 %2515 }
 0xdc2   :  { %3906 = vrcp.f32 %v2516_v49  ;;  %v2528_v23 = vand.u32 2147483648, %v2516_v49  ;;  %v2526_v12 = vand.u32 2147483647, %v2516_v49  ;;  %vm2522_vm5 = vweird.f32 %v2516_v49 }
 0xdc4   :  { %v2529_v41 = vor.u32 1.1754944e-38, %v2528_v23  ;;  %vm2527_vm9 = vcmp.eq.f32.partialorder %v2526_v12, 8.507059e+37 }
 0xdc8   :  { %v3907_v9 = vpop.eup %3906 }
 0xdc9   :  { %v2518_v43 = vmul.f32 %v3907_v9, %v2516_v49  ;;  %v2868_v63 = vpop.permute.xlu2 %2867  ;;  %vm2523_vm4 = vweird.f32 %v3907_v9 }
 0xdca   :  { %v2888_v47 = vand.u32 4294901760, %v2868_v63  ;;  %vm2524_vm7 = vmor %vm2522_vm5, %vm2523_vm4 }
 0xdcb   :  { %v2519_v58 = vsub.f32 1.0, %v2518_v43  ;;  %v3028_v43 = vld [vmem:[%s4501_s2 + $0x10] sm:$0xff] }
 0xdcc   :  { %v2915_v55 = vsub.f32 %v2868_v63, %v2888_v47  ;;  %v4313_v45 = vand.u32 4294901760, %v3028_v43 }
 0xdcd   :  { %v2520_v46 = vmul.f32 %v3907_v9, %v2519_v58 }
 0xdce   :  { %v2916_v40 = vand.u32 4294901760, %v2915_v55  ;;  %v4323_v44 = vsub.f32 %v3028_v43, %v4313_v45 }
 0xdcf   :  { %v2521_v11 = vadd.f32 %v3907_v9, %v2520_v46  ;;  %v3026_v46 = vld [vmem:[%s4501_s2] sm:$0xff] }
 0xdd0   :  { %v2917_v62 = vsub.f32 %v2915_v55, %v2916_v40 }
 0xdd1   :  { %v2525_v48 = vsel %vm2524_vm7, %v3907_v9, %v2521_v11  ;;  %v1011_v50 = vpop.permute.xlu2 %1010  ;;  %v3093_v11 = vand.u32 4294901760, %v4323_v44 }
 0xdd2   :  { %v2530_v34 = vsel %vm2527_vm9, %v2529_v41, %v2525_v48  ;;  %1014 = vst.msk [vmem:[#allocation2] sm:$0xff] %vm1013_vm6, %v1011_v50  ;;  %v2918_v3 = vand.u32 4294901760, %v2917_v62 }
 0xdd3   :  { %v2531_v61 = vmul.f32 %v3905_v27, %v2530_v34  ;;  %v3094_v48 = vsub.f32 %v4323_v44, %v3093_v11 }
 0xdd5   :  { %v2536_v52 = vsel %vm350_vm8, %v2531_v61, 0 }
 0xdd6   :  { %v2555_v53 = vand.u32 4294901760, %v2536_v52 }
 0xdd8   :  { %2586 = vmatmul.f32.vlgmr.msra.gmra.mxu3 %v2555_v53  ;;  %v2556_v57 = vsub.f32 %v2536_v52, %v2555_v53 }
 0xdd9   :  { %2789 = vmatpush.xpose.msra.mxu3 %v4264_v25  ;;  %v1683_v49 = vpop.permute.xlu2 %1682 }
 0xdda   :  { %2610 = vmatmul.f32.vlgmr.msrb.gmra.mxu0 %v2556_v57  ;;  %v2557_v60 = vand.u32 4294901760, %v2556_v57 }
 0xddb   :  { %2815 = vmatpush.xpose.msrb.mxu0 %v2740_v29 }
 0xddc   :  { %2634 = vmatmul.f32.vlgmr.msrb.gmra.mxu1 %v2557_v60  ;;  %v2558_v1 = vsub.f32 %v2556_v57, %v2557_v60 }
 0xddd   :  { %2837 = vmatpush.xpose.msrb.mxu1 %v4264_v25 }
 0xdde   :  { %v2559_v2 = vand.u32 4294901760, %v2558_v1 }
 0xde0   :  { %2560 = vmatmul.f32.vlgmr.msra.gmra.mxu2 %v2559_v2  ;;  %2680 = vmatmul.f32.vlgmr.msrb.gmra.mxu3 %v2555_v53 }
 0xde1   :  { %2766 = vmatpush.xpose.msra.mxu2 %v4267_v26  ;;  %2919 = vmatpush.msrb.mxu3 %v2918_v3 }
 0xde2   :  { %2719 = vmatmul.f32.vlgmr.msra.gmra.mxu0 %v2718_v4 }
 0xde3   :  { %2942 = vmatpush.msra.mxu0 %v2915_v55  ;;  %v3095_v55 = vand.u32 4294901760, %v3094_v48 }
 0xde4   :  { %2745 = vmatmul.f32.vlgmr.msra.gmra.mxu1 %v2714_v56 }
 0xde5   :  { %2965 = vmatpush.msra.mxu1 %v2888_v47 }
 0xde8   :  { %2658 = vmatmul.f32.vlgmr.msrb.gmra.mxu2 %v2555_v53  ;;  %2793 = vmatmul.f32.vlgmr.msra.gmra.mxu3 %v2716_v54 }
 0xde9   :  { %2889 = vmatpush.msrb.mxu2 %v2888_v47  ;;  %3013 = vmatpush.msra.mxu3 %v2888_v47  ;;  %v4331_v47 = vand.u32 4294901760, %v3026_v46 }
 0xdea   :  { %2817 = vmatmul.f32.vlgmr.msrb.gmra.mxu0 %v2714_v56 }
 0xdeb   :  { %v4340_v34 = vsub.f32 %v3026_v46, %v4331_v47 }
 0xdec   :  { %2839 = vmatmul.f32.vlgmr.msrb.gmra.mxu1 %v2714_v56 }
 0xdf0   :  { %2769 = vmatmul.f32.vlgmr.msra.gmra.mxu2 %v2715_v51  ;;  %v3105_v51 = vand.u32 4294901760, %v4340_v34 }
 0xdf1   :  { %2991 = vmatpush.msra.mxu2 %v2916_v40 }
 0xdf2   :  { %v3106_v40 = vsub.f32 %v4340_v34, %v3105_v51 }
 0xdf4   :  { %v3107_v54 = vand.u32 4294901760, %v3106_v40  ;;  %v3916_v40 = vld [vmem:[#allocation3] sm:$0xff] }
 0xe57   :  { %v2611_v6 = vpop.f32.mrf.mxu0 }
 0xe59   :  { %v2635_v14 = vpop.f32.mrf.mxu1 }
 0xe5b   :  { %v2587_v5 = vpop.f32.mrf.mxu3 }
 0xe5f   :  { %v2720_v24 = vpop.f32.mrf.mxu0 }
 0xe61   :  { %v2746_v26 = vpop.f32.mrf.mxu1 }
 0xe62   :  { %v2747_v27 = vadd.f32 %v2746_v26, %v2720_v24 }
 0xe63   :  { %v2561_v7 = vpop.f32.mrf.mxu2  ;;  %v2681_v17 = vpop.f32.mrf.mxu3 }
 0xe64   :  { %v2588_v8 = vadd.f32 %v2587_v5, %v2561_v7 }
 0xe66   :  { %v2612_v15 = vadd.f32 %v2611_v6, %v2588_v8 }
 0xe67   :  { %v2818_v13 = vpop.f32.mrf.mxu0 }
 0xe68   :  { %v2636_v16 = vadd.f32 %v2635_v14, %v2612_v15 }
 0xe69   :  { %v2840_v31 = vpop.f32.mrf.mxu1 }
 0xe6b   :  { %v2659_v20 = vpop.f32.mrf.mxu2  ;;  %v2794_v59 = vpop.f32.mrf.mxu3 }
 0xe6c   :  { %v2660_v22 = vadd.f32 %v2659_v20, %v2636_v16 }
 0xe6e   :  { %v2682_v25 = vadd.f32 %v2681_v17, %v2660_v22 }
 0xe70   :  { %2685 = vrot.lane.b32.xlu2 %v2682_v25, %s4013_s26 }
 0xe73   :  { %v2770_v28 = vpop.f32.mrf.mxu2 }
 0xe74   :  { %v2771_v29 = vadd.f32 %v2770_v28, %v2747_v27 }
 0xe76   :  { %v2795_v30 = vadd.f32 %v2794_v59, %v2771_v29 }
 0xe78   :  { %v2819_v21 = vadd.f32 %v2818_v13, %v2795_v30 }
 0xe7a   :  { %v2841_v32 = vadd.f32 %v2840_v31, %v2819_v21 }
 0xe7c   :  { %v2843_v33 = vsel %vm350_vm8, %v2841_v32, -inf }
 0xe7d   :  { %2844 = vmax.xlane.f32.xlu1 %v2843_v33 }
 0xe96   :  { %1346 = vrot.lane.b32.xlu1 %v4199_v38, %s4013_s26  ;;  %v3029_v38 = vld [vmem:[%s4501_s2 + $0x18] sm:$0xff] }
 0xe97   :  { %v4304_v9 = vand.u32 4294901760, %v3029_v38 }
 0xe99   :  { %3049 = vmatpush.msrb.mxu0 %v4304_v9  ;;  %v4311_v63 = vsub.f32 %v3029_v38, %v4304_v9 }
 0xe9b   :  { %3051 = vmatpush.msrb.mxu0 %v4313_v45  ;;  %v3087_v58 = vand.u32 4294901760, %v4311_v63 }
 0xe9d   :  { %v3088_v12 = vsub.f32 %v4311_v63, %v3087_v58 }
 0xe9f   :  { %v3089_v41 = vand.u32 4294901760, %v3088_v12 }
 0xea1   :  { %3090 = vmatpush.msrb.mxu1 %v3089_v41 }
 0xea3   :  { %3096 = vmatpush.msrb.mxu1 %v3095_v55 }
 0xeca   :  { %v2686_v20 = vpop.permute.xlu2 %2685 }
 0xef0   :  { %v2845_v36 = vpop.xlane.xlu1 %2844 }
 0xef1   :  { %v2846_v19 = vsub.f32 %v2841_v32, %v2845_v36 }
 0xef3   :  { %v2847_v37 = vmul.f32 1.442695, %v2846_v19 }
 0xef5   :  { %3908 = vpow2.f32 %v2847_v37 }
 0xefb   :  { %v3909_v39 = vpop.eup %3908 }
 0xefc   :  { %v2849_v35 = vsel %vm350_vm8, %v3909_v39, 0.0 }
 0xefd   :  { %2850 = vadd.xlane.f32.xlu0 %v2849_v35 }
 0xf08   :  { %v1347_v42 = vpop.permute.xlu1 %1346 }
 0xf09   :  { %1350 = vst.msk [vmem:[#allocation2] sm:$0xff] %vm1349_vm10, %v1347_v42 }
 0xf0a   :  { %1686 = vst.msk [vmem:[#allocation2] sm:$0xff] %vm1685_vm11, %v1683_v49 }
 0xf11   :  { %2350 = vrot.lane.b32.xlu0 %v4256_v0, %s3998_s30  ;;  %v3027_v0 = vld [vmem:[%s4501_s2 + $0x8] sm:$0xff]  ;;  %v3024_v62 = vld [vmem:[#allocation2] sm:$0xff]  ;;  %s3827_s2 = sshll.u32 %s4505_s6, 4  ;;  %s3828_s2 = int_to_ptr.hbm [resolvable:$true] %s3827_s2 }
 0xf12   :  { %v4320_v23 = vand.u32 4294901760, %v3027_v0  ;;  %v3031_v4 = vsel %vm62_vm0, %v3024_v62, 0 }
 0xf13   :  { %v4348_v7 = vand.u32 4294901760, %v3031_v4 }
 0xf14   :  { %3053 = vmatpush.msrb.mxu0 %v4320_v23  ;;  %v4334_v56 = vsub.f32 %v3027_v0, %v4320_v23 }
 0xf15   :  { %v3057_v17 = vsub.f32 %v3031_v4, %v4348_v7  ;;  %v3917_v4 = vld [vmem:[#allocation3 + $0x8] sm:$0xff] }
 0xf16   :  { %3055 = vmatpush.msrb.mxu0 %v4331_v47  ;;  %v3099_v50 = vand.u32 4294901760, %v4334_v56 }
 0xf17   :  { %v3058_v26 = vand.u32 4294901760, %v3057_v17 }
 0xf18   :  { %v3100_v61 = vsub.f32 %v4334_v56, %v3099_v50 }
 0xf19   :  { %v3059_v29 = vsub.f32 %v3057_v17, %v3058_v26 }
 0xf1a   :  { %v3101_v53 = vand.u32 4294901760, %v3100_v61 }
 0xf1b   :  { %v3060_v30 = vand.u32 4294901760, %v3059_v29 }
 0xf1c   :  { %3102 = vmatpush.msrb.mxu1 %v3101_v53 }
 0xf1e   :  { %3108 = vmatpush.msrb.mxu1 %v3107_v54 }
 0xf70   :  { %v2851_v52 = vpop.xlane.xlu0 %2850 }
 0xf71   :  { %3910 = vrcp.f32 %v2851_v52  ;;  %v2863_v1 = vand.u32 2147483648, %v2851_v52  ;;  %v2861_v3 = vand.u32 2147483647, %v2851_v52  ;;  %vm2857_vm13 = vweird.f32 %v2851_v52 }
 0xf73   :  { %v2864_v6 = vor.u32 1.1754944e-38, %v2863_v1  ;;  %vm2862_vm15 = vcmp.eq.f32.partialorder %v2861_v3, 8.507059e+37 }
 0xf77   :  { %v3911_v57 = vpop.eup %3910 }
 0xf78   :  { %v2853_v60 = vmul.f32 %v3911_v57, %v2851_v52  ;;  %vm2858_vm12 = vweird.f32 %v3911_v57 }
 0xf79   :  { %vm2859_vm14 = vmor %vm2857_vm13, %vm2858_vm12 }
 0xf7a   :  { %v2854_v18 = vsub.f32 1.0, %v2853_v60 }
 0xf7c   :  { %v2855_v2 = vmul.f32 %v3911_v57, %v2854_v18 }
 0xf7e   :  { %v2856_v5 = vadd.f32 %v3911_v57, %v2855_v2 }
 0xf80   :  { %v2860_v8 = vsel %vm2859_vm14, %v3911_v57, %v2856_v5 }
 0xf81   :  { %v2865_v14 = vsel %vm2862_vm15, %v2864_v6, %v2860_v8 }
 0xf82   :  { %v2866_v15 = vmul.f32 %v3909_v39, %v2865_v14 }
 0xf83   :  { %v2351_v16 = vpop.permute.xlu0 %2350 }
 0xf84   :  { %2353 = vst.msk [vmem:[#allocation2 + $0x8] sm:$0xff] %vm1013_vm6, %v2351_v16  ;;  %v2871_v22 = vsel %vm350_vm8, %v2866_v15, 0  ;;  %vm3542_vm6 = vcmask 523264  }
 0xf85   :  { %2688 = vst.msk [vmem:[#allocation2 + $0x8] sm:$0xff] %vm1349_vm10, %v2686_v20  ;;  %v2890_v24 = vand.u32 4294901760, %v2871_v22 }
 0xf87   :  { %2921 = vmatmul.f32.vlgmr.msrb.gmra.mxu3 %v2890_v24  ;;  %v2891_v25 = vsub.f32 %v2871_v22, %v2890_v24 }
 0xf88   :  { %3166 = vmatpush.msrb.mxu3 %v4304_v9 }
 0xf89   :  { %2945 = vmatmul.f32.vlgmr.msra.gmra.mxu0 %v2891_v25  ;;  %v2892_v27 = vand.u32 4294901760, %v2891_v25 }
 0xf8a   :  { %3168 = vmatpush.msrb.mxu3 %v4313_v45  ;;  %3201 = vmatpush.msra.mxu0 %v3087_v58 }
 0xf8b   :  { %2969 = vmatmul.f32.vlgmr.msra.gmra.mxu1 %v2892_v27  ;;  %v2893_v28 = vsub.f32 %v2891_v25, %v2892_v27 }
 0xf8c   :  { %3170 = vmatpush.msrb.mxu3 %v4320_v23  ;;  %3236 = vmatpush.msra.mxu1 %v4304_v9 }
 0xf8d   :  { %v2894_v59 = vand.u32 4294901760, %v2893_v28  ;;  %3205 = vmatpush.msra.mxu0 %v3093_v11  ;;  %v3306_v28 = vld [vmem:[%s4502_s3 + $0x10] sm:$0xff] }
 0xf8e   :  { %3172 = vmatpush.msrb.mxu3 %v4331_v47  ;;  %3238 = vmatpush.msra.mxu1 %v4313_v45 }
 0xf8f   :  { %2895 = vmatmul.f32.vlgmr.msrb.gmra.mxu2 %v2894_v59  ;;  %3015 = vmatmul.f32.vlgmr.msra.gmra.mxu3 %v2890_v24  ;;  %v3329_v59 = vand.u32 4294901760, %v3306_v28 }
 0xf90   :  { %3132 = vmatpush.msrb.mxu2 %v4311_v63  ;;  %3240 = vmatpush.msra.mxu1 %v4320_v23 }
 0xf91   :  { %3061 = vmatmul.f32.vlgmr.msrb.gmra.mxu0 %v3060_v30  ;;  %v3305_v30 = vld [vmem:[%s4502_s3 + $0x8] sm:$0xff] }
 0xf92   :  { %3135 = vmatpush.msrb.mxu2 %v4323_v44  ;;  %3242 = vmatpush.msra.mxu1 %v4331_v47 }
 0xf93   :  { %3110 = vmatmul.f32.vlgmr.msrb.gmra.mxu1 %v4348_v7  ;;  %3209 = vmatpush.msra.mxu0 %v3099_v50 }
 0xf94   :  { %3138 = vmatpush.msrb.mxu2 %v4334_v56 }
 0xf95   :  { %3213 = vmatpush.msra.mxu0 %v3105_v51 }
 0xf96   :  { %3141 = vmatpush.msrb.mxu2 %v4340_v34 }
 0xf97   :  { %2993 = vmatmul.f32.vlgmr.msra.gmra.mxu2 %v2890_v24  ;;  %3176 = vmatmul.f32.vlgmr.msrb.gmra.mxu3 %v3058_v26  ;;  %v3307_v26 = vld [vmem:[%s4502_s3 + $0x18] sm:$0xff] }
 0xf98   :  { %v3327_v27 = vand.u32 4294901760, %v3307_v26 }
 0xf9a   :  { %v3365_v29 = vsub.f32 %v3307_v26, %v3327_v27  ;;  %3445 = vmatpush.msrb.mxu1 %v3327_v27  ;;  %3328 = vmatpush.msra.mxu2 %v3327_v27 }
 0xf9c   :  { %3411 = vmatpush.msrb.mxu0 %v3365_v29  ;;  %3447 = vmatpush.msrb.mxu1 %v3329_v59 }
 0xf9d   :  { %3330 = vmatpush.msra.mxu2 %v3329_v59 }
 0xf9f   :  { %3144 = vmatmul.f32.vlgmr.msrb.gmra.mxu2 %v3057_v17 }
0x1006   :  { %v2946_v32 = vpop.f32.mrf.mxu0 }
0x1008   :  { %v2970_v36 = vpop.f32.mrf.mxu1 }
0x100a   :  { %v2922_v13 = vpop.f32.mrf.mxu3 }
0x100e   :  { %v3062_v44 = vpop.f32.mrf.mxu0 }
0x1010   :  { %v3111_v23 = vpop.f32.mrf.mxu1 }
0x1011   :  { %v3112_v47 = vadd.f32 %v3111_v23, %v3062_v44 }
0x1012   :  { %v2896_v21 = vpop.f32.mrf.mxu2  ;;  %v3016_v35 = vpop.f32.mrf.mxu3 }
0x1013   :  { %v2923_v31 = vadd.f32 %v2922_v13, %v2896_v21  ;;  %v3366_v13 = vand.u32 4294901760, %v3365_v29  ;;  %v3371_v21 = vsub.f32 %v3306_v28, %v3329_v59  ;;  %v3540_v28 = vld [vmem:[%s4503_s4 + $0x38] sm:$0xff] }
0x1015   :  { %v2947_v33 = vadd.f32 %v2946_v32, %v2923_v31  ;;  %v3331_v31 = vand.u32 4294901760, %v3305_v30  ;;  %v3304_v32 = vld [vmem:[%s4502_s3] sm:$0xff]  ;;  %3414 = vmatpush.msrb.mxu0 %v3371_v21 }
0x1017   :  { %v2971_v19 = vadd.f32 %v2970_v36, %v2947_v33  ;;  %v3367_v33 = vsub.f32 %v3365_v29, %v3366_v13  ;;  %v3372_v36 = vand.u32 4294901760, %v3371_v21  ;;  %3449 = vmatpush.msrb.mxu1 %v3331_v31  ;;  %3332 = vmatpush.msra.mxu2 %v3331_v31  ;;  %v4417_v29 = vand.u32 4294901760, %v3540_v28 }
0x101a   :  { %v2994_v37 = vpop.f32.mrf.mxu2  ;;  %v3177_v41 = vpop.f32.mrf.mxu3 }
0x101b   :  { %v2995_v39 = vadd.f32 %v2994_v37, %v2971_v19  ;;  %v3377_v19 = vsub.f32 %v3305_v30, %v3331_v31  ;;  %v3333_v37 = vand.u32 4294901760, %v3304_v32  ;;  %v4423_v30 = vsub.f32 %v3540_v28, %v4417_v29 }
0x101d   :  { %v3017_v42 = vadd.f32 %v3016_v35, %v2995_v39  ;;  %v3368_v39 = vand.u32 4294901760, %v3367_v33  ;;  %v3373_v35 = vsub.f32 %v3371_v21, %v3372_v36  ;;  %3417 = vmatpush.msrb.mxu0 %v3377_v19  ;;  %3451 = vmatpush.msrb.mxu1 %v3333_v37  ;;  %v3538_v21 = vld [vmem:[%s4503_s4 + $0x28] sm:$0xff] }
0x101e   :  { %3334 = vmatpush.msra.mxu2 %v3333_v37  ;;  %v4437_v33 = vand.u32 4294901760, %v3538_v21 }
0x101f   :  { %3020 = vrot.lane.b32.xlu2 %v3017_v42, %s4012_s25  ;;  %v3378_v42 = vand.u32 4294901760, %v3377_v19  ;;  %3369 = vmatpush.msra.mxu3 %v3368_v39 }
0x1020   :  { %3480 = vmatpush.msrb.mxu2 %v3366_v13  ;;  %v4449_v39 = vsub.f32 %v3538_v21, %v4437_v33 }
0x1022   :  { %v3145_v12 = vpop.f32.mrf.mxu2  ;;  %3484 = vmatpush.msrb.mxu2 %v3372_v36  ;;  %v3537_v36 = vld [vmem:[%s4503_s4 + $0x20] sm:$0xff] }
0x1023   :  { %v3146_v56 = vadd.f32 %v3145_v12, %v3112_v47 }
0x1024   :  { %3488 = vmatpush.msrb.mxu2 %v3378_v42 }
0x1025   :  { %v3178_v50 = vadd.f32 %v3177_v41, %v3146_v56 }
0x1079   :  { %v3021_v49 = vpop.permute.xlu2 %3020 }
0x107a   :  { %3023 = vst.msk [vmem:[#allocation2 + $0x8] sm:$0xff] %vm1685_vm11, %v3021_v49  ;;  %v3383_v49 = vsub.f32 %v3304_v32, %v3333_v37 }
0x107c   :  { %3420 = vmatpush.msrb.mxu0 %v3383_v49 }
0x1081   :  { %v3025_v38 = vld [vmem:[#allocation2 + $0x8] sm:$0xff] }
0x1082   :  { %v3034_v9 = vsel %vm62_vm0, %v3025_v38, 0  ;;  %v3374_v38 = vand.u32 4294901760, %v3373_v35  ;;  %v4452_v35 = vand.u32 4294901760, %v3537_v36 }
0x1083   :  { %v3064_v43 = vand.u32 4294901760, %v3034_v9 }
0x1084   :  { %3375 = vmatpush.msra.mxu3 %v3374_v38 }
0x1085   :  { %3114 = vmatmul.f32.gmra.mxu1 %v3064_v43  ;;  %v3065_v63 = vsub.f32 %v3034_v9, %v3064_v43  ;;  %v3379_v9 = vsub.f32 %v3377_v19, %v3378_v42  ;;  %v3536_v42 = vld [vmem:[%s4503_s4 + $0x18] sm:$0xff] }
0x1087   :  { %3149 = vmatmul.f32.gmra.mxu2 %v3065_v63  ;;  %v3066_v45 = vand.u32 4294901760, %v3065_v63 }
0x1089   :  { %3182 = vmatmul.f32.gmra.mxu3 %v3066_v45  ;;  %v3067_v0 = vsub.f32 %v3065_v63, %v3066_v45  ;;  %v3380_v63 = vand.u32 4294901760, %v3379_v9  ;;  %v3612_v9 = vand.u32 4294901760, %v4449_v39 }
0x108b   :  { %v3068_v58 = vand.u32 4294901760, %v3067_v0  ;;  %3381 = vmatpush.msra.mxu3 %v3380_v63  ;;  %v4464_v63 = vand.u32 4294901760, %v3536_v42 }
0x108d   :  { %3069 = vmatmul.f32.gmra.mxu0 %v3068_v58  ;;  %3244 = vmatmul.f32.vlgmr.msra.gmra.mxu1 %v4348_v7 }
0x1095   :  { %3215 = vmatmul.f32.vlgmr.msra.gmra.mxu0 %v4348_v7  ;;  %3248 = vmatmul.f32.gmra.mxu1 %v3064_v43 }
0x1096   :  { %3558 = vmatpush.msra.mxu0 %v4417_v29 }
0x109d   :  { %3219 = vmatmul.f32.gmra.mxu0 %v3064_v43  ;;  %v3384_v43 = vand.u32 4294901760, %v3383_v49 }
0x109f   :  { %v3385_v45 = vsub.f32 %v3383_v49, %v3384_v43  ;;  %3492 = vmatpush.msrb.mxu2 %v3384_v43  ;;  %v3617_v43 = vsub.f32 %v3537_v36, %v4452_v35 }
0x10a1   :  { %v3386_v0 = vand.u32 4294901760, %v3385_v45  ;;  %v3535_v45 = vld [vmem:[%s4503_s4 + $0x10] sm:$0xff] }
0x10a3   :  { %3387 = vmatpush.msra.mxu3 %v3386_v0 }
0x10a5   :  { %3515 = vmatpush.msrb.mxu3 %v3327_v27 }
0x10a7   :  { %3517 = vmatpush.msrb.mxu3 %v3329_v59  ;;  %v3539_v59 = vld [vmem:[%s4503_s4 + $0x30] sm:$0xff] }
0x10a8   :  { %v4425_v13 = vand.u32 4294901760, %v3539_v59 }
0x10a9   :  { %3519 = vmatpush.msrb.mxu3 %v3331_v31  ;;  %v3600_v31 = vand.u32 4294901760, %v4423_v30 }
0x10aa   :  { %v4434_v32 = vsub.f32 %v3539_v59, %v4425_v13  ;;  %3560 = vmatpush.msra.mxu0 %v4425_v13 }
0x10ab   :  { %3521 = vmatpush.msrb.mxu3 %v3333_v37  ;;  %v3601_v19 = vsub.f32 %v4423_v30, %v3600_v31 }
0x10ac   :  { %v3606_v37 = vand.u32 4294901760, %v4434_v32  ;;  %3562 = vmatpush.msra.mxu0 %v4437_v33 }
0x10ad   :  { %v3602_v49 = vand.u32 4294901760, %v3601_v19 }
0x10ae   :  { %v3607_v38 = vsub.f32 %v4434_v32, %v3606_v37  ;;  %3564 = vmatpush.msra.mxu0 %v4452_v35 }
0x10af   :  { %3603 = vmatpush.msra.mxu1 %v3602_v49 }
0x10b0   :  { %v3608_v0 = vand.u32 4294901760, %v3607_v38  ;;  %3566 = vmatpush.msra.mxu0 %v4464_v63 }
0x10b2   :  { %3609 = vmatpush.msra.mxu1 %v3608_v0 }
0x1102   :  { %v3115_v46 = vpop.f32.mrf.mxu1 }
0x110a   :  { %v3070_v11 = vpop.f32.mrf.mxu0  ;;  %v3245_v34 = vpop.f32.mrf.mxu1 }
0x110b   :  { %v3116_v48 = vadd.f32 %v3115_v46, %v3070_v11  ;;  %v3150_v51 = vpop.f32.mrf.mxu2 }
0x110c   :  { %v3183_v57 = vpop.f32.mrf.mxu3 }
0x110d   :  { %v3151_v52 = vadd.f32 %v3150_v51, %v3116_v48  ;;  %v3870_v51 = vld [vmem:[#allocation6 + $0x2] ss:$0 sm:$0xff] }
0x110f   :  { %v3184_v60 = vadd.f32 %v3183_v57, %v3151_v52 }
0x1112   :  { %v3216_v55 = vpop.f32.mrf.mxu0  ;;  %v3249_v2 = vpop.f32.mrf.mxu1 }
0x1113   :  { %v3217_v61 = vadd.f32 %v3216_v55, %v3178_v50 }
0x1115   :  { %v3246_v53 = vadd.f32 %v3245_v34, %v3217_v61 }
0x1117   :  { %v4374_v54 = vadd.f32 %v3916_v40, %v3246_v53  ;;  %v3871_v40 = vld [vmem:[#allocation6 + $0x3] ss:$0 sm:$0xff] }
0x1119   :  { %v3254_v62 = vsel %vm62_vm0, %v4374_v54, 0.0 }
0x111a   :  { %v3220_v18 = vpop.f32.mrf.mxu0  ;;  %3255 = vadd.xlane.f32.xlu0 %v3254_v62 }
0x111b   :  { %v3221_v1 = vadd.f32 %v3220_v18, %v3184_v60 }
0x111d   :  { %v3250_v3 = vadd.f32 %v3249_v2, %v3221_v1 }
0x111f   :  { %v4378_v5 = vadd.f32 %v3917_v4, %v3250_v3 }
0x1121   :  { %v3257_v6 = vsel %vm62_vm0, %v4378_v5, 0.0 }
0x1122   :  { %3258 = vadd.xlane.f32.xlu2 %v3257_v6 }
0x118d   :  { %v3256_v7 = vpop.xlane.xlu0 %3255 }
0x118e   :  { %v3260_v8 = vmul.f32 %v3256_v7, %v4061_v10 }
0x1190   :  { %v4384_v14 = vsub.f32 %v4374_v54, %v3260_v8 }
0x1192   :  { %v3264_v15 = vmul.f32 %v4384_v14, %v4384_v14 }
0x1194   :  { %v3266_v16 = vsel %vm62_vm0, %v3264_v15, 0.0 }
0x1195   :  { %3267 = vadd.xlane.f32.xlu1 %v3266_v16  ;;  %v3259_v17 = vpop.xlane.xlu2 %3258 }
0x1196   :  { %v3261_v20 = vmul.f32 %v3259_v17, %v4061_v10 }
0x1198   :  { %v4391_v22 = vsub.f32 %v4378_v5, %v3261_v20 }
0x119a   :  { %v3265_v24 = vmul.f32 %v4391_v22, %v4391_v22 }
0x119c   :  { %v3269_v25 = vsel %vm62_vm0, %v3265_v24, 0.0 }
0x119d   :  { %3270 = vadd.xlane.f32.xlu2 %v3269_v25 }
0x1208   :  { %v3268_v58 = vpop.xlane.xlu1 %3267 }
0x1209   :  { %v3272_v23 = vmul.f32 %v3268_v58, %v4061_v10  ;;  %v3613_v58 = vsub.f32 %v4449_v39, %v3612_v9 }
0x120b   :  { %v3274_v44 = vadd.f32 1e-06, %v3272_v23  ;;  %v3618_v23 = vand.u32 4294901760, %v3617_v43 }
0x120d   :  { %3912 = vrsqrt.f32 %v3274_v44  ;;  %vm3282_vm1 = vweird.f32 %v3274_v44 }
0x1210   :  { %v3271_v46 = vpop.xlane.xlu2 %3270 }
0x1211   :  { %v3273_v12 = vmul.f32 %v3271_v46, %v4061_v10  ;;  %v3623_v46 = vsub.f32 %v3536_v42, %v4464_v63 }
0x1213   :  { %v3913_v11 = vpop.eup %3912  ;;  %v3275_v47 = vadd.f32 1e-06, %v3273_v12  ;;  %v3534_v12 = vld [vmem:[%s4503_s4 + $0x8] sm:$0xff] }
0x1214   :  { %v3277_v56 = vmul.f32 %v3913_v11, %v3274_v44  ;;  %vm3283_vm8 = vweird.f32 %v3913_v11  ;;  %v3567_v44 = vand.u32 4294901760, %v3535_v45 }
0x1215   :  { %3914 = vrsqrt.f32 %v3275_v47  ;;  %vm3284_vm2 = vmor %vm3282_vm1, %vm3283_vm8  ;;  %vm3292_vm4 = vweird.f32 %v3275_v47 }
0x1216   :  { %v3278_v41 = vmul.f32 %v3913_v11, %v3277_v56  ;;  %v3629_v56 = vsub.f32 %v3535_v45, %v3567_v44  ;;  %3568 = vmatpush.msra.mxu0 %v3567_v44 }
0x1218   :  { %v3279_v48 = vmul.f32 0.5, %v3278_v41  ;;  %v3569_v41 = vand.u32 4294901760, %v3534_v12 }
0x121a   :  { %v3280_v50 = vsub.f32 1.5, %v3279_v48  ;;  %v3624_v48 = vand.u32 4294901760, %v3623_v46  ;;  %3570 = vmatpush.msra.mxu0 %v3569_v41 }
0x121b   :  { %v3915_v34 = vpop.eup %3914 }
0x121c   :  { %v3281_v55 = vmul.f32 %v3913_v11, %v3280_v50  ;;  %v3287_v61 = vmul.f32 %v3915_v34, %v3275_v47  ;;  %vm3293_vm3 = vweird.f32 %v3915_v34  ;;  %v3619_v47 = vsub.f32 %v3617_v43, %v3618_v23  ;;  %v3533_v50 = vld [vmem:[%s4503_s4] sm:$0xff]  ;;  %s4014_s4 = smov [#allocation8]  }
0x121d   :  { %vm3294_vm5 = vmor %vm3292_vm4, %vm3293_vm3  ;;  %s3825_s5 = sshll.u32 %s4014_s4, 4  ;;  %s3826_s5 = int_to_ptr.vmem [resolvable:$true] %s3825_s5 }
0x121e   :  { %v3285_v52 = vsel %vm3284_vm2, %v3913_v11, %v3281_v55  ;;  %v3288_v53 = vmul.f32 %v3915_v34, %v3287_v61  ;;  %v3614_v11 = vand.u32 4294901760, %v3613_v58  ;;  %v3630_v55 = vand.u32 4294901760, %v3629_v56 }
0x121f   :  { %v3296_v57 = vmul.f32 %v3285_v52, %v4384_v14  ;;  %v3635_v61 = vsub.f32 %v3534_v12, %v3569_v41  ;;  %v3625_v52 = vsub.f32 %v3623_v46, %v3624_v48  ;;  %v3873_v12 = vld [vmem:[#allocation6 + $0x5] ss:$0 sm:$0xff] }
0x1220   :  { %v3289_v10 = vmul.f32 0.5, %v3288_v53  ;;  %3615 = vmatpush.msra.mxu1 %v3614_v11  ;;  %v3631_v53 = vsub.f32 %v3629_v56, %v3630_v55 }
0x1221   :  { %v3299_v60 = vmul.f32 %v3870_v51, %v3296_v57 }
0x1222   :  { %v3290_v62 = vsub.f32 1.5, %v3289_v10  ;;  %v3626_v10 = vand.u32 4294901760, %v3625_v52 }
0x1223   :  { %v3302_v18 = vadd.f32 %v3871_v40, %v3299_v60  ;;  %v3632_v60 = vand.u32 4294901760, %v3631_v53 }
0x1224   :  { %v3291_v1 = vmul.f32 %v3915_v34, %v3290_v62 }
0x1225   :  { %v3310_v2 = vsel %vm62_vm0, %v3302_v18, 0 }
0x1226   :  { %v3295_v3 = vsel %vm3294_vm5, %v3915_v34, %v3291_v1  ;;  %v3335_v4 = vand.u32 4294901760, %v3310_v2  ;;  %v3620_v34 = vand.u32 4294901760, %v3619_v47 }
0x1227   :  { %v3297_v6 = vmul.f32 %v3295_v3, %v4391_v22 }
0x1228   :  { %3389 = vmatmul.f32.vlgmr.msra.gmra.mxu3 %v3335_v4  ;;  %v3336_v7 = vsub.f32 %v3310_v2, %v3335_v4  ;;  %3621 = vmatpush.msra.mxu1 %v3620_v34 }
0x1229   :  { %v3300_v8 = vmul.f32 %v3870_v51, %v3297_v6  ;;  %3707 = vmatpush.msra.mxu3 %v4417_v29  ;;  %v3571_v51 = vand.u32 4294901760, %v3533_v50  ;;  %v3872_v6 = vld [vmem:[#allocation6 + $0x4] ss:$0 sm:$0xff] }
0x122a   :  { %3423 = vmatmul.f32.vlgmr.msrb.gmra.mxu0 %v3336_v7  ;;  %v3337_v15 = vand.u32 4294901760, %v3336_v7  ;;  %3627 = vmatpush.msra.mxu1 %v3626_v10 }
0x122b   :  { %v3303_v14 = vadd.f32 %v3871_v40, %v3300_v8  ;;  %3709 = vmatpush.msra.mxu3 %v4425_v13  ;;  %v3636_v40 = vand.u32 4294901760, %v3635_v61  ;;  %v3641_v57 = vsub.f32 %v3533_v50, %v3571_v51  ;;  %3572 = vmatpush.msra.mxu0 %v3571_v51 }
0x122c   :  { %3455 = vmatmul.f32.vlgmr.msrb.gmra.mxu1 %v3337_v15  ;;  %v3338_v16 = vsub.f32 %v3336_v7, %v3337_v15 }
0x122d   :  { %v3313_v17 = vsel %vm62_vm0, %v3303_v14, 0  ;;  %3711 = vmatpush.msra.mxu3 %v4437_v33  ;;  %v3637_v62 = vsub.f32 %v3635_v61, %v3636_v40  ;;  %v3642_v18 = vand.u32 4294901760, %v3641_v57  ;;  %3746 = vmatpush.msrb.mxu0 %v3600_v31 }
0x122e   :  { %v3339_v20 = vand.u32 4294901760, %v3338_v16  ;;  %v3343_v24 = vand.u32 4294901760, %v3313_v17  ;;  %3633 = vmatpush.msra.mxu1 %v3632_v60 }
0x122f   :  { %3713 = vmatpush.msra.mxu3 %v4452_v35  ;;  %v3638_v1 = vand.u32 4294901760, %v3637_v62  ;;  %v3643_v2 = vsub.f32 %v3641_v57, %v3642_v18  ;;  %3750 = vmatpush.msrb.mxu0 %v3606_v37 }
0x1230   :  { %3340 = vmatmul.f32.vlgmr.msra.gmra.mxu2 %v3339_v20  ;;  %3393 = vmatmul.f32.gmra.mxu3 %v3343_v24  ;;  %v3344_v25 = vsub.f32 %v3313_v17, %v3343_v24 }
0x1231   :  { %3665 = vmatpush.msra.mxu2 %v4423_v30  ;;  %3715 = vmatpush.msra.mxu3 %v4464_v63  ;;  %v3644_v3 = vand.u32 4294901760, %v3643_v2 }
0x1232   :  { %3428 = vmatmul.f32.gmra.mxu0 %v3344_v25  ;;  %v3345_v26 = vand.u32 4294901760, %v3344_v25  ;;  %3639 = vmatpush.msra.mxu1 %v3638_v1 }
0x1233   :  { %3668 = vmatpush.msra.mxu2 %v4434_v32  ;;  %3717 = vmatpush.msra.mxu3 %v3567_v44 }
0x1234   :  { %3461 = vmatmul.f32.gmra.mxu1 %v3345_v26  ;;  %v3346_v27 = vsub.f32 %v3344_v25, %v3345_v26  ;;  %3754 = vmatpush.msrb.mxu0 %v3612_v9 }
0x1235   :  { %3671 = vmatpush.msra.mxu2 %v4449_v39  ;;  %3719 = vmatpush.msra.mxu3 %v3569_v41 }
0x1236   :  { %v3347_v22 = vand.u32 4294901760, %v3346_v27  ;;  %3645 = vmatpush.msra.mxu1 %v3644_v3  ;;  %3758 = vmatpush.msrb.mxu0 %v3618_v23 }
0x1237   :  { %3674 = vmatpush.msra.mxu2 %v3617_v43  ;;  %3721 = vmatpush.msra.mxu3 %v3571_v51 }
0x1238   :  { %3348 = vmatmul.f32.gmra.mxu2 %v3347_v22  ;;  %3523 = vmatmul.f32.vlgmr.msrb.gmra.mxu3 %v3335_v4 }
0x1239   :  { %3677 = vmatpush.msra.mxu2 %v3623_v46  ;;  %3793 = vmatpush.msrb.mxu1 %v4417_v29 }
0x123a   :  { %3762 = vmatpush.msrb.mxu0 %v3624_v48 }
0x123b   :  { %3680 = vmatpush.msra.mxu2 %v3629_v56  ;;  %3795 = vmatpush.msrb.mxu1 %v4425_v13 }
0x123c   :  { %3766 = vmatpush.msrb.mxu0 %v3630_v55 }
0x123d   :  { %3683 = vmatpush.msra.mxu2 %v3635_v61  ;;  %3797 = vmatpush.msrb.mxu1 %v4437_v33 }
0x123e   :  { %3770 = vmatpush.msrb.mxu0 %v3636_v40 }
0x123f   :  { %3686 = vmatpush.msra.mxu2 %v3641_v57  ;;  %3799 = vmatpush.msrb.mxu1 %v4452_v35 }
0x1240   :  { %3494 = vmatmul.f32.vlgmr.msrb.gmra.mxu2 %v3335_v4  ;;  %3527 = vmatmul.f32.gmra.mxu3 %v3343_v24 }
0x1241   :  { %3801 = vmatpush.msrb.mxu1 %v4464_v63  ;;  %3774 = vmatpush.msrb.mxu0 %v3642_v18 }
0x1243   :  { %3803 = vmatpush.msrb.mxu1 %v3567_v44 }
0x1245   :  { %3805 = vmatpush.msrb.mxu1 %v3569_v41 }
0x1247   :  { %3807 = vmatpush.msrb.mxu1 %v3571_v51 }
0x1248   :  { %3498 = vmatmul.f32.gmra.mxu2 %v3343_v24 }
0x12a7   :  { %v3424_v16 = vpop.f32.mrf.mxu0 }
0x12a9   :  { %v3456_v25 = vpop.f32.mrf.mxu1 }
0x12ab   :  { %v3390_v4 = vpop.f32.mrf.mxu3 }
0x12af   :  { %v3429_v59 = vpop.f32.mrf.mxu0 }
0x12b1   :  { %v3462_v31 = vpop.f32.mrf.mxu1 }
0x12b3   :  { %v3341_v7 = vpop.f32.mrf.mxu2  ;;  %v3394_v15 = vpop.f32.mrf.mxu3 }
0x12b4   :  { %v3342_v8 = vadd.f32 %v3872_v6, %v3341_v7 }
0x12b6   :  { %v3391_v14 = vadd.f32 %v3390_v4, %v3342_v8 }
0x12b8   :  { %v3425_v24 = vadd.f32 %v3424_v16, %v3391_v14 }
0x12ba   :  { %v3457_v27 = vadd.f32 %v3456_v25, %v3425_v24 }
0x12bb   :  { %v3349_v17 = vpop.f32.mrf.mxu2  ;;  %v3524_v22 = vpop.f32.mrf.mxu3 }
0x12bc   :  { %v3350_v20 = vadd.f32 %v3872_v6, %v3349_v17 }
0x12be   :  { %v3395_v26 = vadd.f32 %v3394_v15, %v3350_v20 }
0x12c0   :  { %v3430_v13 = vadd.f32 %v3429_v59, %v3395_v26 }
0x12c2   :  { %v3463_v33 = vadd.f32 %v3462_v31, %v3430_v13 }
0x12c3   :  { %v3495_v28 = vpop.f32.mrf.mxu2  ;;  %v3528_v35 = vpop.f32.mrf.mxu3 }
0x12c4   :  { %v3496_v29 = vadd.f32 %v3495_v28, %v3457_v27 }
0x12c6   :  { %v3525_v30 = vadd.f32 %v3524_v22, %v3496_v29 }
0x12c8   :  { %v3531_v21 = vmax.f32 %v3525_v30, 0.0 }
0x12ca   :  { %v3544_v32 = vsel %vm3542_vm6, %v3531_v21, 0 }
0x12cb   :  { %v3573_v36 = vand.u32 4294901760, %v3544_v32  ;;  %v3499_v19 = vpop.f32.mrf.mxu2 }
0x12cc   :  { %v3500_v37 = vadd.f32 %v3499_v19, %v3463_v33 }
0x12cd   :  { %v3574_v39 = vsub.f32 %v3544_v32, %v3573_v36  ;;  %3647 = vmatmul.f32.vlgmr.msra.gmra.mxu1 %v3573_v36 }
0x12ce   :  { %v3529_v42 = vadd.f32 %v3528_v35, %v3500_v37 }
0x12cf   :  { %v3575_v49 = vand.u32 4294901760, %v3574_v39  ;;  %3689 = vmatmul.f32.vlgmr.msra.gmra.mxu2 %v3574_v39 }
0x12d0   :  { %v3532_v38 = vmax.f32 %v3529_v42, 0.0 }
0x12d1   :  { %v3576_v9 = vsub.f32 %v3574_v39, %v3575_v49  ;;  %3725 = vmatmul.f32.vlgmr.msra.gmra.mxu3 %v3575_v49 }
0x12d2   :  { %v3547_v43 = vsel %vm3542_vm6, %v3532_v38, 0 }
0x12d3   :  { %v3577_v63 = vand.u32 4294901760, %v3576_v9  ;;  %v3581_v45 = vand.u32 4294901760, %v3547_v43 }
0x12d5   :  { %3578 = vmatmul.f32.vlgmr.msra.gmra.mxu0 %v3577_v63  ;;  %3651 = vmatmul.f32.gmra.mxu1 %v3581_v45  ;;  %v3582_v0 = vsub.f32 %v3547_v43, %v3581_v45 }
0x12d7   :  { %3694 = vmatmul.f32.gmra.mxu2 %v3582_v0  ;;  %v3583_v58 = vand.u32 4294901760, %v3582_v0 }
0x12d9   :  { %3731 = vmatmul.f32.gmra.mxu3 %v3583_v58  ;;  %v3584_v23 = vsub.f32 %v3582_v0, %v3583_v58 }
0x12db   :  { %v3585_v44 = vand.u32 4294901760, %v3584_v23 }
0x12dd   :  { %3586 = vmatmul.f32.gmra.mxu0 %v3585_v44  ;;  %3809 = vmatmul.f32.vlgmr.msrb.gmra.mxu1 %v3573_v36 }
0x12e5   :  { %3776 = vmatmul.f32.vlgmr.msrb.gmra.mxu0 %v3573_v36  ;;  %3813 = vmatmul.f32.gmra.mxu1 %v3581_v45 }
0x12ed   :  { %3780 = vmatmul.f32.gmra.mxu0 %v3581_v45 }
0x134a   :  { %v3648_v46 = vpop.f32.mrf.mxu1 }
0x1352   :  { %v3579_v11 = vpop.f32.mrf.mxu0  ;;  %v3652_v56 = vpop.f32.mrf.mxu1 }
0x1353   :  { %v3580_v47 = vadd.f32 %v3873_v12, %v3579_v11  ;;  %v3690_v48 = vpop.f32.mrf.mxu2 }
0x1354   :  { %v3726_v61 = vpop.f32.mrf.mxu3 }
0x1355   :  { %v3649_v41 = vadd.f32 %v3648_v46, %v3580_v47 }
0x1357   :  { %v3691_v34 = vadd.f32 %v3690_v48, %v3649_v41 }
0x1359   :  { %v3727_v51 = vadd.f32 %v3726_v61, %v3691_v34 }
0x135a   :  { %v3587_v50 = vpop.f32.mrf.mxu0  ;;  %v3810_v53 = vpop.f32.mrf.mxu1 }
0x135b   :  { %v3588_v55 = vadd.f32 %v3873_v12, %v3587_v50  ;;  %v3695_v10 = vpop.f32.mrf.mxu2 }
0x135c   :  { %v3732_v1 = vpop.f32.mrf.mxu3 }
0x135d   :  { %v3653_v52 = vadd.f32 %v3652_v56, %v3588_v55 }
0x135f   :  { %v3696_v60 = vadd.f32 %v3695_v10, %v3653_v52 }
0x1361   :  { %v3733_v2 = vadd.f32 %v3732_v1, %v3696_v60 }
0x1362   :  { %v3777_v40 = vpop.f32.mrf.mxu0  ;;  %v3814_v6 = vpop.f32.mrf.mxu1 }
0x1363   :  { %v3778_v57 = vadd.f32 %v3777_v40, %v3727_v51 }
0x1365   :  { %v3811_v62 = vadd.f32 %v3810_v53, %v3778_v57 }
0x1367   :  { %v3817_v18 = vadd.f32 %v3811_v62, %v4374_v54 }
0x1369   :  { %3819 = vst.msk [vmem:[#allocation8] sm:$0xff] %vm62_vm0, %v3817_v18 }
0x136a   :  { %v3781_v3 = vpop.f32.mrf.mxu0 }
0x136b   :  { %v3782_v4 = vadd.f32 %v3781_v3, %v3733_v2 }
0x136d   :  { %v3815_v7 = vadd.f32 %v3814_v6, %v3782_v4 }
0x136f   :  { %v3818_v8 = vadd.f32 %v3815_v7, %v4378_v5 }
0x1371   :  { %3820 = vst.msk [vmem:[#allocation8 + $0x8] sm:$0xff] %vm62_vm0, %v3818_v8 }
0x1372   :  { %3833 = dma.vmem_to_hbm [thread:$0]  %s3826_s5, 256, %s3828_s2, [#allocation5], %s3997_s29, %s3997_s29, %s3998_s30  }
0x1373   :  { %3994 = dma.done.wait [#allocation5], 256  }
0x1374   :  { %3995 = vsyncadd [#allocation5], 4294967040 }
0x1375   :  { %3838 = vsyncpa [#allocation4], 1 }
0x1376   :  { %3839 = vsyncpa [#allocation7], 1 }
0x1377   :  { %3840 = vsyncpa [#allocation5], 1 }

</bundles_post_ra>
